<compile_context>
chip_gen: v7x
topology: tpu7x:2x2x1
jax: 0.10.0
libtpu: 0.0.40
codegen_flags: <defaults>
</compile_context>

<pallas_src>
import jax
import jax.numpy as jnp
from jax import lax
from jax.experimental import pallas as pl
from jax.experimental.pallas import tpu as pltpu


def _upsample_conv_kernel(body_ref, halo_ref, w_ref, b_ref, o_ref):
    """One (TH x W) low-res row-tile of the fused upsample+conv.

    body_ref: (1, TH, W+2, C)    padded low-res rows [j*TH, j*TH+TH)
    halo_ref: (1, 2,  W+2, C)    padded low-res rows [j*TH+TH, j*TH+TH+2)
    w_ref:    (4*C, 9*C)         folded weights, rows (py, px, cout), cols (a, b, cin)
    b_ref:    (4*C, 1)           bias tiled per phase
    o_ref:    (1, 1, 4*C, TH*W)  lane-dense output, lanes ordered (i, jcol)
    """
    th = body_ref.shape[1]
    wp = body_ref.shape[2]
    c = body_ref.shape[3]
    w = wp - 2
    m = th * w

    # Padded input tile for this row group: (TH+2, W+2, C). Cheap concat on the major dim.
    xt = jnp.concatenate([body_ref[0], halo_ref[0]], axis=0)

    # im2col over the 9 low-res taps -> one MXU-friendly (M, 9C) operand.
    # TODO(synk): build the slabs from a ((TH+2)*(W+2), C)-flattened view so each tap is a
    # contiguous sublane window (avoids the strided relayout per slab at the cost of a few
    # junk columns that the wrapper already crops).
    slabs = [xt[a:a + th, b:b + w, :].reshape(m, c)
             for a in range(3) for b in range(3)]
    patches = jnp.concatenate(slabs, axis=1)                         # (M, 9*C)

    # (4C, 9C) . (M, 9C)^T on the MXU (attention-style "contract last dims"):
    #   * output lanes = M (dense, fills the MXU columns even for C=4)
    #   * result is already in the lane-dense store layout -> no in-kernel transpose.
    res_t = lax.dot_general(
        w_ref[...], patches,
        dimension_numbers=(((1,), (1,)), ((), ())),
        preferred_element_type=jnp.float32)                          # (4*C, M)
    res_t = res_t + b_ref[...]                                       # (4*C, 1) broadcast

    o_ref[0, 0] = res_t.astype(o_ref.dtype)


def _fold_weights(weight_oihw):
    """Fold (Cout, Cin, 3, 3) into the fused (4*Cout, 9*Cin) sub-pixel weight.

    S[p, a, d] = 1 iff conv tap d of output phase p reads absolute low-res padded
    row/col tap a; taps outside a phase's 2x2 support are zero, so a single matmul
    computes all four phases at once (K = 9*Cin).
    TODO(synk): for C >~ 64 switch to the 4-phase K=4*Cin layout (2.25x fewer MXU FLOPs);
    the fused form below is chosen for the small/medium-C, memory-bound regime.
    """
    dt = weight_oihw.dtype
    s = jnp.array([[[1., 0., 0.], [0., 1., 1.], [0., 0., 0.]],    # even output rows/cols
                   [[0., 0., 0.], [1., 1., 0.], [0., 0., 1.]]],   # odd output rows/cols
                  dt)
    c_out, c_in = weight_oihw.shape[0], weight_oihw.shape[1]
    wf = jnp.einsum('pad,qbe,oide->pqoabi', s, s, weight_oihw)    # (py,px,co,a,b,ci)
    return wf.reshape(4 * c_out, 9 * c_in)


def _vmem_capacity_bytes():
    """Physical VMEM per TensorCore; fall back to the v7x floor (safe everywhere)."""
    try:
        cap = getattr(pltpu.get_tpu_info(), "vmem_capacity_bytes", None)
        if cap:
            return int(cap)
    except Exception:
        pass
    return 64 * 1024 * 1024


def _tile_vmem_bytes(th, w, c, in_isz):
    """Estimated VMEM footprint of one grid step (double-buffered blocks + temporaries)."""
    wp, m = w + 2, th * w
    body = th * wp * c * in_isz
    halo = 2 * wp * c * in_isz
    out = m * 4 * c * in_isz
    wgt = (9 * c * 4 * c + 4 * c) * in_isz
    pipeline = 2 * (body + halo + out + wgt)                  # 2x: Pallas double buffering
    temps = ((th + 2) * wp * c + 2 * m * 9 * c) * in_isz      # xt + slab/patches builds
    temps += 2 * m * 4 * c * 4                                # f32 matmul result + slack
    return pipeline + temps


def _pick_row_tile(n, h, w, c, itemsize, budget_bytes):
    """Largest EVEN row-tile TH whose modeled footprint fits the VMEM budget."""
    th_cap = h + (h % 2)                                      # at most one tile per image
    if n == 1 and h >= 4:
        # Keep >= 2 tiles so a (N=1, T) grid still feeds both v7x TensorCores.
        th_cap = min(th_cap, max(2, (h // 2) & ~1))
    th, cand = 2, 2
    while cand <= th_cap:
        if _tile_vmem_bytes(cand, w, c, itemsize) <= budget_bytes:
            th = cand
        cand += 2
    return th


def upsample_forward(x_nchw, weight_oihw, bias):
    """Equivalent of: F.interpolate(x, scale_factor=2, mode='nearest'); conv3x3(pad=1)."""
    n, c, h, w = x_nchw.shape
    itemsize = x_nchw.dtype.itemsize

    vmem_cap = _vmem_capacity_bytes()
    vmem_limit = min(vmem_cap * 5 // 8, 100 * 1024 * 1024)    # 40 MiB on v7x, 80 MiB on v5e/v6e
    th = _pick_row_tile(n, h, w, c, itemsize, budget_bytes=int(vmem_limit * 0.4))
    t = pl.cdiv(h, th)
    hp = t * th                                               # padded low-res height

    # ---- glue: a single pad over the LOW-RES tensor; no overlapping-window copy ----
    x = jnp.transpose(x_nchw, (0, 2, 3, 1))                   # NHWC, low-res
    xp = jnp.pad(x, ((0, 0), (1, 1 + hp - h), (1, 1), (0, 0)))  # (N, Hp+2, W+2, C)

    wf = _fold_weights(weight_oihw.astype(jnp.float32))       # (4C, 9C)
    b4 = jnp.tile(bias.astype(jnp.float32), 4).reshape(4 * c, 1)

    # TODO(synk): for production cast xp / wf to bfloat16 here (keep the f32 MXU accumulate
    # and f32 bias) to halve HBM traffic and double MXU rate; kept f32 to match module numerics.

    half_th = th // 2
    out_ph = pl.pallas_call(
        _upsample_conv_kernel,
        out_shape=jax.ShapeDtypeStruct((n, t, 4 * c, th * w), x_nchw.dtype),
        grid_spec=pltpu.PrefetchScalarGridSpec(
            num_scalar_prefetch=0,
            grid=(n, t),
            in_specs=[
                # Body rows [j*TH, (j+1)*TH) of the padded input.
                pl.BlockSpec((1, th, w + 2, c), lambda i, j: (i, j, 0, 0)),
                # Bottom 2-row halo [(j+1)*TH, (j+1)*TH+2): same array, block height 2,
                # block index (j+1)*TH/2 -> only 2 duplicated rows per tile.
                pl.BlockSpec((1, 2, w + 2, c),
                             lambda i, j: (i, (j + 1) * half_th, 0, 0)),
                pl.BlockSpec((4 * c, 9 * c), lambda i, j: (0, 0)),
                pl.BlockSpec((4 * c, 1), lambda i, j: (0, 0)),
            ],
            out_specs=pl.BlockSpec((1, 1, 4 * c, th * w),
                                   lambda i, j: (i, j, 0, 0)),
        ),
        compiler_params=pltpu.CompilerParams(
            dimension_semantics=("parallel", "parallel"),
            vmem_limit_bytes=int(vmem_limit),
        ),
    )(xp, xp, wf, b4)

    # Un-tangle phases -> NCHW with ONE fused XLA transpose (the NCHW module contract
    # forces one output pass anyway).
    # TODO(synk): keep the surrounding model NHWC end-to-end to drop this pass entirely.
    out = out_ph.reshape(n, t, 2, 2, c, th, w)                # (n, t, py, px, co, i, jcol)
    out = jnp.transpose(out, (0, 4, 1, 5, 2, 6, 3))           # (n, co, t, i, py, jcol, px)
    out = out.reshape(n, c, 2 * hp, 2 * w)
    return out[:, :, :2 * h, :]


def _reference(x_nchw, weight_oihw, bias):
    x = jnp.repeat(jnp.repeat(x_nchw, 2, axis=2), 2, axis=3)
    y = lax.conv_general_dilated(
        x, weight_oihw, window_strides=(1, 1), padding=((1, 1), (1, 1)),
        dimension_numbers=("NCHW", "OIHW", "NCHW"),
    )
    return y + bias[None, :, None, None]


if __name__ == "__main__":
    key = jax.random.PRNGKey(0)
    k_x, k_w, k_b = jax.random.split(key, 3)

    N, C, H, W = 2, 4, 16, 16
    x = jax.random.normal(k_x, (N, C, H, W), dtype=jnp.float32)

    # Deterministic parameters matching nn.Conv2d(channels, channels, 3) shapes.
    fan_in = C * 3 * 3
    bound = 1.0 / (fan_in ** 0.5)
    weight = jax.random.uniform(k_w, (C, C, 3, 3), minval=-bound, maxval=bound,
                                dtype=jnp.float32)
    bias = jax.random.uniform(k_b, (C,), minval=-bound, maxval=bound,
                              dtype=jnp.float32)

    fwd = jax.jit(upsample_forward)
    out = jax.block_until_ready(fwd(x, weight, bias))

    ref = _reference(x, weight, bias)
    assert out.shape == (N, C, 2 * H, 2 * W)
    assert jnp.allclose(out, ref, atol=1e-4, rtol=1e-4), \
        float(jnp.max(jnp.abs(out - ref)))

    print("KERNEL_OK")
</pallas_src>

<mosaic_0001>
module attributes {stable_mosaic.version = 11 : i64} {
  func.func @_upsample_conv_kernel(%arg0: i32, %arg1: i32, %arg2: memref<1x16x18x4xf32, #tpu.memory_space<vmem>>, %arg3: memref<1x2x18x4xf32, #tpu.memory_space<vmem>>, %arg4: memref<16x36xf32, #tpu.memory_space<vmem>>, %arg5: memref<16x1xf32, #tpu.memory_space<vmem>>, %arg6: memref<1x1x16x256xf32, #tpu.memory_space<vmem>>) attributes {dimension_semantics = [#tpu.dimension_semantics<parallel>, #tpu.dimension_semantics<parallel>], iteration_bounds = array<i64: 2, 1>, scalar_prefetch = 0 : i64, scratch_operands = 0 : i64, tpu.core_type = #tpu.core_type<tc>, window_params = [{transform_indices = @transform_0, window_bounds = array<i64: 1, 16, 18, 4>}, {transform_indices = @transform_1, window_bounds = array<i64: 1, 2, 18, 4>}, {pipeline_mode = #tpu.pipeline_mode<synchronous>, transform_indices = @transform_2, window_bounds = array<i64: 16, 36>}, {pipeline_mode = #tpu.pipeline_mode<synchronous>, transform_indices = @transform_3, window_bounds = array<i64: 16, 1>}, {transform_indices = @transform_4, window_bounds = array<i64: 1, 1, 16, 256>}]} {
    %c0 = arith.constant 0 : index
    %c0_0 = arith.constant 0 : index
    %c0_1 = arith.constant 0 : index
    %c0_2 = arith.constant 0 : index
    %0 = vector.load %arg2[%c0, %c0_0, %c0_1, %c0_2] : memref<1x16x18x4xf32, #tpu.memory_space<vmem>>, vector<1x16x18x4xf32>
    %1 = vector.shape_cast %0 : vector<1x16x18x4xf32> to vector<16x18x4xf32>
    %c0_3 = arith.constant 0 : index
    %c0_4 = arith.constant 0 : index
    %c0_5 = arith.constant 0 : index
    %c0_6 = arith.constant 0 : index
    %2 = vector.load %arg3[%c0_3, %c0_4, %c0_5, %c0_6] : memref<1x2x18x4xf32, #tpu.memory_space<vmem>>, vector<1x2x18x4xf32>
    %3 = vector.shape_cast %2 : vector<1x2x18x4xf32> to vector<2x18x4xf32>
    %4 = tpu.concatenate %1, %3 in 0 : vector<16x18x4xf32>, vector<2x18x4xf32> -> vector<18x18x4xf32>
    %5 = vector.extract_strided_slice %4 {offsets = [0, 0, 0], sizes = [16, 16, 4], strides = [1, 1, 1]} : vector<18x18x4xf32> to vector<16x16x4xf32>
    %6 = vector.shape_cast %5 : vector<16x16x4xf32> to vector<256x4xf32>
    %7 = vector.extract_strided_slice %4 {offsets = [0, 1, 0], sizes = [16, 16, 4], strides = [1, 1, 1]} : vector<18x18x4xf32> to vector<16x16x4xf32>
    %8 = vector.shape_cast %7 : vector<16x16x4xf32> to vector<256x4xf32>
    %9 = vector.extract_strided_slice %4 {offsets = [0, 2, 0], sizes = [16, 16, 4], strides = [1, 1, 1]} : vector<18x18x4xf32> to vector<16x16x4xf32>
    %10 = vector.shape_cast %9 : vector<16x16x4xf32> to vector<256x4xf32>
    %11 = vector.extract_strided_slice %4 {offsets = [1, 0, 0], sizes = [16, 16, 4], strides = [1, 1, 1]} : vector<18x18x4xf32> to vector<16x16x4xf32>
    %12 = vector.shape_cast %11 : vector<16x16x4xf32> to vector<256x4xf32>
    %13 = vector.extract_strided_slice %4 {offsets = [1, 1, 0], sizes = [16, 16, 4], strides = [1, 1, 1]} : vector<18x18x4xf32> to vector<16x16x4xf32>
    %14 = vector.shape_cast %13 : vector<16x16x4xf32> to vector<256x4xf32>
    %15 = vector.extract_strided_slice %4 {offsets = [1, 2, 0], sizes = [16, 16, 4], strides = [1, 1, 1]} : vector<18x18x4xf32> to vector<16x16x4xf32>
    %16 = vector.shape_cast %15 : vector<16x16x4xf32> to vector<256x4xf32>
    %17 = vector.extract_strided_slice %4 {offsets = [2, 0, 0], sizes = [16, 16, 4], strides = [1, 1, 1]} : vector<18x18x4xf32> to vector<16x16x4xf32>
    %18 = vector.shape_cast %17 : vector<16x16x4xf32> to vector<256x4xf32>
    %19 = vector.extract_strided_slice %4 {offsets = [2, 1, 0], sizes = [16, 16, 4], strides = [1, 1, 1]} : vector<18x18x4xf32> to vector<16x16x4xf32>
    %20 = vector.shape_cast %19 : vector<16x16x4xf32> to vector<256x4xf32>
    %21 = vector.extract_strided_slice %4 {offsets = [2, 2, 0], sizes = [16, 16, 4], strides = [1, 1, 1]} : vector<18x18x4xf32> to vector<16x16x4xf32>
    %22 = vector.shape_cast %21 : vector<16x16x4xf32> to vector<256x4xf32>
    %23 = tpu.concatenate %6, %8, %10, %12, %14, %16, %18, %20, %22 in 1 : vector<256x4xf32>, vector<256x4xf32>, vector<256x4xf32>, vector<256x4xf32>, vector<256x4xf32>, vector<256x4xf32>, vector<256x4xf32>, vector<256x4xf32>, vector<256x4xf32> -> vector<256x36xf32>
    %c0_7 = arith.constant 0 : index
    %c0_8 = arith.constant 0 : index
    %24 = vector.load %arg4[%c0_7, %c0_8] : memref<16x36xf32, #tpu.memory_space<vmem>>, vector<16x36xf32>
    %cst = arith.constant dense<0.000000e+00> : vector<16x256xf32>
    %25 = tpu.matmul %24, %23, %cst {dimension_numbers = #tpu.dot_dimension_numbers<[1], [1], [0], [0], [0, 0, 1, 0], [], []>} : vector<16x36xf32>, vector<256x36xf32>, vector<16x256xf32> -> vector<16x256xf32>
    %c0_9 = arith.constant 0 : index
    %c0_10 = arith.constant 0 : index
    %26 = vector.load %arg5[%c0_9, %c0_10] : memref<16x1xf32, #tpu.memory_space<vmem>>, vector<16x1xf32>
    %27 = vector.broadcast %26 : vector<16x1xf32> to vector<16x256xf32>
    %28 = arith.addf %25, %27 : vector<16x256xf32>
    %c0_11 = arith.constant 0 : index
    %c0_12 = arith.constant 0 : index
    %c0_13 = arith.constant 0 : index
    %c0_14 = arith.constant 0 : index
    %29 = vector.load %arg6[%c0_11, %c0_12, %c0_13, %c0_14] : memref<1x1x16x256xf32, #tpu.memory_space<vmem>>, vector<1x1x16x256xf32>
    %30 = vector.shape_cast %29 : vector<1x1x16x256xf32> to vector<16x256xf32>
    %31 = vector.shape_cast %28 : vector<16x256xf32> to vector<1x1x16x256xf32>
    tpu.vector_store %arg6[%c0_11, %c0_12, %c0_13, %c0_14], %31 {strides = array<i32>} : memref<1x1x16x256xf32, #tpu.memory_space<vmem>>, vector<1x1x16x256xf32>,
    return
  }
  func.func @transform_0(%arg0: i32, %arg1: i32) -> (i32, i32, i32, i32) {
    %c0_i32 = arith.constant 0 : i32
    %c0_i32_0 = arith.constant 0 : i32
    %c0_i32_1 = arith.constant 0 : i32
    return %arg0, %arg1, %c0_i32, %c0_i32_0 : i32, i32, i32, i32
  }
  func.func @transform_1(%arg0: i32, %arg1: i32) -> (i32, i32, i32, i32) {
    %c1_i32 = arith.constant 1 : i32
    %0 = arith.addi %arg1, %c1_i32 : i32
    %c8_i32 = arith.constant 8 : i32
    %1 = arith.muli %0, %c8_i32 : i32
    %c0_i32 = arith.constant 0 : i32
    %c0_i32_0 = arith.constant 0 : i32
    %c0_i32_1 = arith.constant 0 : i32
    return %arg0, %1, %c0_i32, %c0_i32_0 : i32, i32, i32, i32
  }
  func.func @transform_2(%arg0: i32, %arg1: i32) -> (i32, i32) {
    %c0_i32 = arith.constant 0 : i32
    %c0_i32_0 = arith.constant 0 : i32
    %c0_i32_1 = arith.constant 0 : i32
    return %c0_i32, %c0_i32_0 : i32, i32
  }
  func.func @transform_3(%arg0: i32, %arg1: i32) -> (i32, i32) {
    %c0_i32 = arith.constant 0 : i32
    %c0_i32_0 = arith.constant 0 : i32
    %c0_i32_1 = arith.constant 0 : i32
    return %c0_i32, %c0_i32_0 : i32, i32
  }
  func.func @transform_4(%arg0: i32, %arg1: i32) -> (i32, i32, i32, i32) {
    %c0_i32 = arith.constant 0 : i32
    %c0_i32_0 = arith.constant 0 : i32
    %c0_i32_1 = arith.constant 0 : i32
    return %arg0, %arg1, %c0_i32, %c0_i32_0 : i32, i32, i32, i32
  }
}

</mosaic_0001>

<bundles_post_ra>
// kernel: tile.8
= control target key start
LH: loop header
LB: loop body
LE: loop exit
PB: predicated region body
PF: predicated region fallthrough
CT: control target
= control target key end

     0   :  { %s22_s0 = inlined_call_operand.vmem [shape: f32[4], index: 0, kind: input, shape index: {}]   ;;  %s23_s1 = inlined_call_operand.vmem [shape: f32[4,4], index: 1, kind: output, shape index: {}]  }
   0x1   :  { %v4_v0 = vld [vmem:[%s22_s0] ss:$0 sm:$0xff] }
   0x2   :  { %5 = vst [vmem:[%s23_s1] sm:$0xf] %v4_v0 }

// kernel: tile.0
= control target key start
LH: loop header
LB: loop body
LE: loop exit
PB: predicated region body
PF: predicated region fallthrough
CT: control target
= control target key end

     0   :  { %s34_s8 = smov 125   ;;  %vm7_vm0 = vcmask 7168   ;;  %s35_s11 = smov 126   ;;  %s61_s0 = inlined_call_operand.vmem [shape: f32[4,4], index: 0, kind: input, shape index: {}]   ;;  %s62_s1 = inlined_call_operand.vmem [shape: f32[16,1], index: 1, kind: output, shape index: {}]  }
   0x1   :  { %v4_v0 = vld [vmem:[%s61_s0] sm:$0xf]  ;;  %s33_s0 = smov 127  }
   0x2   :  { %5 = vst [vmem:[#allocation0] sm:$0xf] %v4_v0 }
   0x9   :  { %v9_v1 = vld [vmem:[#allocation0] sm:$0xf]  }
   0xa   :  { %v21_v2 = vld [vmem:[#allocation0] sm:$0xf]   ;;  %10 = vrot.lane.b32.xlu0 %v9_v1, %s33_s0 }
   0xb   :  { %22 = vrot.lane.b32.xlu1 %v21_v2, %s34_s8  ;;  %v6_v3 = vld [vmem:[#allocation0] sm:$0xf]  }
   0xc   :  { %v15_v4 = vld [vmem:[#allocation0] sm:$0xf]   ;;  %8 = vst.msk [vmem:[%s62_s1] ss:$4 sm:$0xf] %vm7_vm0, %v6_v3  }
   0xe   :  { %16 = vrot.lane.b32.xlu0 %v15_v4, %s35_s11 }
  0x7c   :  { %v11_v5 = vpop.permute.xlu0 %10  }
  0x7d   :  { %v23_v6 = vpop.permute.xlu1 %22   ;;  %27 = vst.msk [vmem:[%s62_s1 + $0x1] ss:$4 sm:$0xf] %vm7_vm0, %v11_v5  }
  0x7e   :  { %29 = vst.msk [vmem:[%s62_s1 + $0x3] ss:$4 sm:$0xf] %vm7_vm0, %v23_v6  }
  0x80   :  { %v17_v7 = vpop.permute.xlu0 %16  }
  0x81   :  { %28 = vst.msk [vmem:[%s62_s1 + $0x2] ss:$4 sm:$0xf] %vm7_vm0, %v17_v7  }

// kernel: upsample_forward.1
= control target key start
LH: loop header
LB: loop body
LE: loop exit
PB: predicated region body
PF: predicated region fallthrough
CT: control target
= control target key end

     0   :  { %s2850_s15 = smov 0   ;;  %s2852_s16 = smov 0   ;;  %s4210_s0 = inlined_call_operand.vmem [shape: f32[2,18,18,4], index: 0, kind: input, shape index: {}, may-alias: {0,1}]   ;;  %s4211_s1 = inlined_call_operand.vmem [shape: f32[2,18,18,4], index: 1, kind: input, shape index: {}, may-alias: {0,1}]   ;;  %s4212_s2 = inlined_call_operand.vmem [shape: f32[16,36], index: 2, kind: input, shape index: {}]   ;;  %s4213_s3 = inlined_call_operand.vmem [shape: f32[16,1], index: 3, kind: input, shape index: {}]   ;;  %s4214_s4 = inlined_call_operand.vmem [shape: f32[2,1,16,256], index: 4, kind: output, shape index: {}]  }
   0x1   :  { %s2854_s17 = smov 0  }
   0x2 LB: > { %s26_s18 = sadd.s32 1, %s2810_s16  ;;  %p1954_p0 = scmp.ge.s32.totalorder %s2814_s17, 1  ;;  %s2814_s17 = sphi %s2854_s17, %s14_s17   ;;  %s2810_s16 = sphi %s2852_s16, %s4308_s16   ;;  %s2806_s15 = sphi %s2850_s15, %s4307_s15  }
   0x3   : > { %p28_p1 = scmp.ge.s32.totalorder %s26_s18, 2  ;;  %p220_p2 = scmp.lt.s32.totalorder %s2814_s17, 3 }
   0x5   : > { %s4310_s18 = smov (%p28_p1, %s26_s18), 0  ;;  %p221_p3 = pnand %p1954_p0, %p220_p2 }
   0x7   : > { %224 = sbr.rel (%p221_p3) target bundleno = 624 (0x270), region = 36 }
   0xe   : > { %p278_p4 = scmp.lt.s32.totalorder %s2806_s15, 1  ;;  %vm419_vm0 = vcmask 1046528   ;;  %s2816_s23 = smov 4   ;;  %vm500_vm1 = vcmask 1045504   ;;  %vm1375_vm2 = vcmask 31744   ;;  %vm1408_vm3 = vcmask 64512  }
   0xf   : > { %s2817_s24 = smov 8   ;;  %s2818_s25 = smov 12   ;;  %vm1441_vm4 = vcmask 97280   ;;  %vm1474_vm5 = vcmask 130048   ;;  %vm1507_vm6 = vcmask 162816   ;;  %vm1540_vm7 = vcmask 195584  }
  0x10   : > { %s4312_s15 = smov (!%p278_p4, %s2806_s15), 1  ;;  %s2819_s26 = smov 16   ;;  %vm1573_vm8 = vcmask 228352   ;;  %vm1606_vm9 = vcmask 261120   ;;  %vm1653_vm10 = vcmask 293888  }
  0x11   : > { %s2098_s19 = smul.u32 432, %s4312_s15  ;;  %s2820_s27 = smov 20   ;;  %vm3761_vm11 = vmpackc.low %vm1653_vm10, %vm1653_vm10 }
  0x12   : > { %s2821_s28 = smov 24   ;;  %s2822_s29 = smov 28  }
  0x13   : > { %s2876_s22 = scalar_lea.vmem %s4210_s0, %s2098_s19  ;;  %s2823_s30 = smov 32  }
  0x14   : > { %v2879_v0 = vld [vmem:[%s2876_s22 + $0x30] sm:$0xff]  ;;  %v2882_v1 = vld [vmem:[%s2876_s22 + $0x38] sm:$0xff]  ;;  %v2885_v2 = vld [vmem:[%s2876_s22 + $0x40] sm:$0x3]  ;;  %s1996_s5 = sadd.s32 384, %s2098_s19  ;;  %s1997_s21 = sshll.u32 %s4312_s15, 5 }
  0x15   : > { %v430_v3 = vrot.slane %v2879_v0, 1  ;;  %v431_v4 = vrot.slane %v2882_v1, 1  ;;  %v433_v5 = vrot.slane %v2885_v2, 1  ;;  %v2891_v6 = vld [vmem:[%s2876_s22] sm:$0xff]  ;;  %v2894_v7 = vld [vmem:[%s2876_s22 + $0x8] sm:$0xff]  ;;  %v2905_v12 = vld [vmem:[%s2876_s22 + $0x50] sm:$0xff]  ;;  %s3622_s8 = scalar_lea.vmem %s4211_s1, %s1996_s5 }
  0x16   : > { %v2897_v8 = vld [vmem:[%s2876_s22 + $0x10] sm:$0x3]  ;;  %v420_v9 = vrot.slane %v2891_v6, 1  ;;  %v421_v10 = vrot.slane %v2894_v7, 1  ;;  %v2902_v11 = vld [vmem:[%s2876_s22 + $0x48] sm:$0xff]  ;;  %v2914_v17 = vld [vmem:[%s2876_s22 + $0x18] sm:$0xff] }
  0x17   : > { %v432_v13 = vsel %vm419_vm0, %v430_v3, %v431_v4  ;;  %v434_v14 = vsel %vm419_vm0, %v431_v4, %v433_v5  ;;  %v423_v15 = vrot.slane %v2897_v8, 1  ;;  %v2911_v16 = vld [vmem:[%s2876_s22 + $0x58] sm:$0x3]  ;;  %v2917_v18 = vld [vmem:[%s2876_s22 + $0x20] sm:$0xff]  ;;  %v435_v21 = vrot.slane %v2902_v11, 1  ;;  %v2949_v36 = vld [vmem:[%s2876_s22 + $0x68] sm:$0xff] }
  0x18   : > { %v2919_v19 = vpack.i.bf16 %v434_v14, %v432_v13  ;;  %v422_v20 = vsel %vm419_vm0, %v420_v9, %v421_v10  ;;  %v436_v22 = vrot.slane %v2905_v12, 1  ;;  %v2925_v23 = vld [vmem:[%s2876_s22 + $0x28] sm:$0x3]  ;;  %v2928_v24 = vld [vmem:[%s2876_s22 + $0x78] sm:$0xff]  ;;  %v2931_v25 = vld [vmem:[%s2876_s22 + $0x80] sm:$0xff]  ;;  %v438_v27 = vrot.slane %v2911_v16, 1 }
  0x19   : > { %v424_v26 = vsel %vm419_vm0, %v421_v10, %v423_v15  ;;  %v425_v28 = vrot.slane %v2914_v17, 1  ;;  %v426_v29 = vrot.slane %v2917_v18, 1  ;;  %v2938_v30 = vld [vmem:[%s2876_s22 + $0x88] sm:$0x3]  ;;  %v2941_v31 = vld [vmem:[%s2876_s22 + $0x60] sm:$0xff]  ;;  %v428_v34 = vrot.slane %v2925_v23, 1 }
  0x1a   : > { %4247 = vst [vmem:[#allocation2_spill] sm:$0xff] %v2919_v19  ;;  %2145 = vrot.lane.b32.xlu1 %v2919_v19, %s2816_s23  ;;  %v2134_v32 = vpack.i.bf16 %v424_v26, %v422_v20  ;;  %v437_v33 = vsel %vm419_vm0, %v435_v21, %v436_v22  ;;  %v445_v35 = vrot.slane %v2928_v24, 1  ;;  %v2952_v37 = vld [vmem:[%s2876_s22 + $0x70] sm:$0x3]  ;;  %v439_v38 = vsel %vm419_vm0, %v436_v22, %v438_v27  ;;  %v2959_v42 = vld [vmem:[%s2876_s22 + $0xa8] sm:$0xff]  ;;  %v2977_v50 = vld [vmem:[%s2876_s22 + $0x98] sm:$0xff] }
  0x1b   : > { %v427_v39 = vsel %vm419_vm0, %v425_v28, %v426_v29  ;;  %v446_v40 = vrot.slane %v2931_v25, 1  ;;  %v448_v41 = vrot.slane %v2938_v30, 1  ;;  %v2962_v43 = vld [vmem:[%s2876_s22 + $0xb0] sm:$0xff]  ;;  %v2965_v44 = vpack.i.bf16 %v439_v38, %v437_v33  ;;  %v2971_v48 = vld [vmem:[%s2876_s22 + $0xb8] sm:$0x3]  ;;  %v2998_v61 = vld [vmem:[%s2876_s22 + $0xe0] sm:$0xff] }
  0x1c   : > { %2135 = vrot.lane.b32.xlu0 %v2134_v32, %s2816_s23  ;;  %v429_v45 = vsel %vm419_vm0, %v426_v29, %v428_v34  ;;  %v440_v46 = vrot.slane %v2941_v31, 1  ;;  %v441_v47 = vrot.slane %v2949_v36, 1  ;;  %v2974_v49 = vld [vmem:[%s2876_s22 + $0x90] sm:$0xff]  ;;  %v443_v54 = vrot.slane %v2952_v37, 1  ;;  %v2985_v55 = vld [vmem:[%s2876_s22 + $0xa0] sm:$0x3] }
  0x1d   : > { %4248 = vst [vmem:[#allocation3_spill] sm:$0xff] %v2965_v44  ;;  %v2979_v51 = vpack.i.bf16 %v429_v45, %v427_v39  ;;  %v447_v52 = vsel %vm419_vm0, %v445_v35, %v446_v40  ;;  %v449_v53 = vsel %vm419_vm0, %v446_v40, %v448_v41  ;;  %v2988_v56 = vld [vmem:[%s2876_s22 + $0xd8] sm:$0xff]  ;;  %v455_v59 = vrot.slane %v2959_v42, 1  ;;  %v3001_v62 = vld [vmem:[%s2876_s22 + $0xe8] sm:$0x3]  ;;  %v3008_v9 = vld [vmem:[%s2876_s22 + $0xc0] sm:$0xff] }
  0x1e   : > { %2150 = vrot.lane.b32.xlu1 %v2965_v44, %s2816_s23  ;;  %v2992_v57 = vpack.i.bf16 %v449_v53, %v447_v52  ;;  %v442_v58 = vsel %vm419_vm0, %v440_v46, %v441_v47  ;;  %v456_v60 = vrot.slane %v2962_v43, 1  ;;  %v444_v63 = vsel %vm419_vm0, %v441_v47, %v443_v54  ;;  %v3011_v10 = vld [vmem:[%s2876_s22 + $0xc8] sm:$0xff]  ;;  %v3021_v21 = vld [vmem:[%s2876_s22 + $0xd0] sm:$0x3]  ;;  %v3041_v39 = vld [vmem:[%s2876_s22 + $0x118] sm:$0x3] }
  0x1f   : > { %4249 = vst [vmem:[#allocation4_spill] sm:$0xff] %v2979_v51  ;;  %v458_v3 = vrot.slane %v2971_v48, 1  ;;  %v450_v4 = vrot.slane %v2974_v49, 1  ;;  %v451_v5 = vrot.slane %v2977_v50, 1  ;;  %v3015_v13 = vpack.i.bf16 %v444_v63, %v442_v58  ;;  %v3028_v29 = vld [vmem:[%s2876_s22 + $0x108] sm:$0xff]  ;;  %v3031_v32 = vld [vmem:[%s2876_s22 + $0x110] sm:$0xff] }
  0x20   : > { %4250 = vst [vmem:[#allocation5_spill] sm:$0xff] %v2992_v57  ;;  %2140 = vrot.lane.b32.xlu0 %v2979_v51, %s2816_s23  ;;  %v457_v14 = vsel %vm419_vm0, %v455_v59, %v456_v60  ;;  %v453_v15 = vrot.slane %v2985_v55, 1  ;;  %v465_v20 = vrot.slane %v2988_v56, 1  ;;  %v466_v27 = vrot.slane %v2998_v61, 1  ;;  %v3044_v40 = vld [vmem:[%s2876_s22 + $0xf0] sm:$0xff]  ;;  %v3047_v41 = vld [vmem:[%s2876_s22 + $0xf8] sm:$0xff] }
  0x21   : > { %4251 = vst [vmem:[#allocation6_spill] sm:$0xff] %v3015_v13  ;;  %v459_v22 = vsel %vm419_vm0, %v456_v60, %v458_v3  ;;  %v452_v26 = vsel %vm419_vm0, %v450_v4, %v451_v5  ;;  %v468_v28 = vrot.slane %v3001_v62, 1  ;;  %v460_v35 = vrot.slane %v3008_v9, 1  ;;  %v3053_v52 = vld [vmem:[%s2876_s22 + $0x100] sm:$0x3]  ;;  %v3056_v53 = vld [vmem:[%s2876_s22 + $0x138] sm:$0xff] }
  0x22   : > { %2160 = vrot.lane.b32.xlu1 %v2992_v57, %s2816_s23  ;;  %v3035_v33 = vpack.i.bf16 %v459_v22, %v457_v14  ;;  %v454_v34 = vsel %vm419_vm0, %v451_v5, %v453_v15  ;;  %v461_v38 = vrot.slane %v3011_v10, 1  ;;  %v467_v45 = vsel %vm419_vm0, %v465_v20, %v466_v27  ;;  %v3066_v63 = vld [vmem:[%s2876_s22 + $0x140] sm:$0xff]  ;;  %v3069_v3 = vld [vmem:[%s2876_s22 + $0x148] sm:$0x3]  ;;  %v3112_v44 = vld [vmem:[%s2876_s22 + $0x150] sm:$0xff] }
  0x23   : > { %v469_v46 = vsel %vm419_vm0, %v466_v27, %v468_v28  ;;  %v463_v47 = vrot.slane %v3021_v21, 1  ;;  %v3060_v54 = vpack.i.bf16 %v454_v34, %v452_v26  ;;  %v475_v59 = vrot.slane %v3028_v29, 1  ;;  %4254 = vst [vmem:[#allocation9_spill] sm:$0xff] %v3069_v3  ;;  %v3076_v20 = vld [vmem:[%s2876_s22 + $0x120] sm:$0xff]  ;;  %v3079_v22 = vld [vmem:[%s2876_s22 + $0x128] sm:$0xff]  ;;  %4259 = vst [vmem:[#allocation14_spill] sm:$0xff] %v3112_v44 }
  0x24   : > { %4252 = vst [vmem:[#allocation7_spill] sm:$0xff] %v3035_v33  ;;  %2155 = vrot.lane.b32.xlu0 %v3015_v13, %s2816_s23  ;;  %v462_v58 = vsel %vm419_vm0, %v460_v35, %v461_v38  ;;  %v476_v60 = vrot.slane %v3031_v32, 1  ;;  %v478_v5 = vrot.slane %v3041_v39, 1  ;;  %v470_v14 = vrot.slane %v3044_v40, 1  ;;  %4255 = vst [vmem:[#allocation10_spill] sm:$0xff] %v3076_v20  ;;  %v3115_v19 = vld [vmem:[%s2876_s22 + $0x158] sm:$0xff] }
  0x25   : > { %4253 = vst [vmem:[#allocation8_spill] sm:$0xff] %v3060_v54  ;;  %v464_v4 = vsel %vm419_vm0, %v461_v38, %v463_v47  ;;  %v471_v15 = vrot.slane %v3047_v41, 1  ;;  %4256 = vst [vmem:[#allocation11_spill] sm:$0xff] %v3079_v22  ;;  %v3083_v26 = vpack.i.bf16 %v469_v46, %v467_v45  ;;  %v473_v28 = vrot.slane %v3053_v52, 1  ;;  %v3089_v35 = vld [vmem:[%s2876_s22 + $0x130] sm:$0x3] }
  0x26   : > { %2170 = vrot.lane.b32.xlu1 %v3035_v33, %s2816_s23  ;;  %v477_v27 = vsel %vm419_vm0, %v475_v59, %v476_v60  ;;  %v485_v34 = vrot.slane %v3056_v53, 1  ;;  %v479_v38 = vsel %vm419_vm0, %v476_v60, %v478_v5  ;;  %v486_v33 = vrot.slane %v3066_v63, 1  ;;  %v3096_v46 = vld [vmem:[%s2876_s22 + $0x168] sm:$0xff]  ;;  %v3099_v59 = vld [vmem:[%s2876_s22 + $0x170] sm:$0xff] }
  0x27   : > { %4257 = vst [vmem:[#allocation12_spill] sm:$0xff] %v3083_v26  ;;  %v472_v47 = vsel %vm419_vm0, %v470_v14, %v471_v15  ;;  %v488_v45 = vrot.slane %v3069_v3, 1  ;;  %v3103_v57 = vpack.i.bf16 %v464_v4, %v462_v58  ;;  %v474_v13 = vsel %vm419_vm0, %v471_v15, %v473_v28  ;;  %v3109_v14 = vld [vmem:[%s2876_s22 + $0x178] sm:$0x3]  ;;  %v3121_v58 = vld [vmem:[%s2876_s22 + $0x160] sm:$0x3] }
  0x28   : > { %2165 = vrot.lane.b32.xlu0 %v3060_v54, %s2816_s23  ;;  %v480_v60 = vrot.slane %v3076_v20, 1  ;;  %v481_v5 = vrot.slane %v3079_v22, 1  ;;  %v487_v51 = vsel %vm419_vm0, %v485_v34, %v486_v33  ;;  %v483_v54 = vrot.slane %v3089_v35, 1 }
  0x29   : > { %4258 = vst [vmem:[#allocation13_spill] sm:$0xff] %v3103_v57  ;;  %v489_v3 = vsel %vm419_vm0, %v486_v33, %v488_v45  ;;  %v3125_v4 = vpack.i.bf16 %v479_v38, %v477_v27  ;;  %v3127_v15 = vpack.i.bf16 %v474_v13, %v472_v47  ;;  %v495_v28 = vrot.slane %v3096_v46, 1 }
  0x2a   : > { %2180 = vrot.lane.b32.xlu1 %v3083_v26, %s2816_s23  ;;  %v496_v22 = vrot.slane %v3099_v59, 1  ;;  %v3131_v20 = vpack.i.bf16 %v489_v3, %v487_v51  ;;  %v498_v34 = vrot.slane %v3109_v14, 1  ;;  %v490_v33 = vrot.slane %v3112_v44, 1 }
  0x2b   : > { %4260 = vst [vmem:[#allocation15_spill] sm:$0xff] %v3125_v4  ;;  %v491_v45 = vrot.slane %v3115_v19, 1  ;;  %v482_v27 = vsel %vm419_vm0, %v480_v60, %v481_v5  ;;  %v484_v13 = vsel %vm419_vm0, %v481_v5, %v483_v54  ;;  %v493_v47 = vrot.slane %v3121_v58, 1 }
  0x2c   : > { %4261 = vst [vmem:[#allocation16_spill] sm:$0xff] %v3131_v20  ;;  %2175 = vrot.lane.b32.xlu0 %v3103_v57, %s2816_s23  ;;  %v497_v38 = vsel %vm419_vm0, %v495_v28, %v496_v22  ;;  %v499_v51 = vsel %vm419_vm0, %v496_v22, %v498_v34  ;;  %v506_v26 = vrot.slane %v2914_v17, 2  ;;  %v507_v44 = vrot.slane %v2917_v18, 2 }
  0x2d   : > { %v492_v3 = vsel %vm419_vm0, %v490_v33, %v491_v45  ;;  %v494_v57 = vsel %vm419_vm0, %v491_v45, %v493_v47  ;;  %v509_v60 = vrot.slane %v2925_v23, 2  ;;  %v501_v54 = vrot.slane %v2891_v6, 2 }
  0x2e   : > { %2190 = vrot.lane.b32.xlu1 %v3125_v4, %s2816_s23  ;;  %v502_v5 = vrot.slane %v2894_v7, 2  ;;  %v504_v22 = vrot.slane %v2897_v8, 2  ;;  %v3155_v28 = vpack.i.bf16 %v484_v13, %v482_v27  ;;  %v514_v34 = vrot.slane %v2885_v2, 2 }
  0x2f   : > { %v3158_v33 = vpack.i.bf16 %v499_v51, %v497_v38  ;;  %v3160_v4 = vpack.i.bf16 %v494_v57, %v492_v3  ;;  %v508_v6 = vsel %vm500_vm1, %v506_v26, %v507_v44  ;;  %v510_v7 = vsel %vm500_vm1, %v507_v44, %v509_v60 }
  0x30   : > { %2185 = vrot.lane.b32.xlu0 %v3127_v15, %s2816_s23  ;;  %v503_v8 = vsel %vm500_vm1, %v501_v54, %v502_v5  ;;  %v516_v23 = vrot.slane %v2902_v11, 2  ;;  %v517_v45 = vrot.slane %v2905_v12, 2  ;;  %v519_v27 = vrot.slane %v2911_v16, 2 }
  0x31   : > { %4262 = vst [vmem:[#allocation17_spill] sm:$0xff] %v3158_v33  ;;  %4263 = vst [vmem:[#allocation18_spill] sm:$0xff] %v3160_v4  ;;  %v511_v2 = vrot.slane %v2879_v0, 2  ;;  %v512_v57 = vrot.slane %v2882_v1, 2  ;;  %v505_v13 = vsel %vm500_vm1, %v502_v5, %v504_v22  ;;  %v526_v26 = vrot.slane %v2928_v24, 2 }
  0x32   : > { %2200 = vrot.lane.b32.xlu1 %v3131_v20, %s2816_s23  ;;  %v527_v44 = vrot.slane %v2931_v25, 2  ;;  %v529_v38 = vrot.slane %v2938_v30, 2  ;;  %v3180_v47 = vpack.i.bf16 %v510_v7, %v508_v6  ;;  %v521_v16 = vrot.slane %v2941_v31, 2 }
  0x33   : > { %v522_v51 = vrot.slane %v2949_v36, 2  ;;  %v524_v3 = vrot.slane %v2952_v37, 2  ;;  %v2214_v60 = vpack.i.bf16 %v505_v13, %v503_v8  ;;  %v518_v54 = vsel %vm500_vm1, %v516_v23, %v517_v45 }
  0x34   : > { %2195 = vrot.lane.b32.xlu0 %v3155_v28, %s2816_s23  ;;  %v520_v5 = vsel %vm500_vm1, %v517_v45, %v519_v27  ;;  %v513_v22 = vsel %vm500_vm1, %v511_v2, %v512_v57  ;;  %v515_v30 = vsel %vm500_vm1, %v512_v57, %v514_v34  ;;  %v528_v6 = vsel %vm500_vm1, %v526_v26, %v527_v44 }
  0x35   : > { %v530_v7 = vsel %vm500_vm1, %v527_v44, %v529_v38  ;;  %v537_v37 = vrot.slane %v2962_v43, 2  ;;  %v539_v8 = vrot.slane %v2971_v48, 2  ;;  %v531_v23 = vrot.slane %v2974_v49, 2 }
  0x36   : > { %2210 = vrot.lane.b32.xlu1 %v3158_v33, %s2816_s23  ;;  %v536_v33 = vrot.slane %v2959_v42, 2  ;;  %v532_v45 = vrot.slane %v2977_v50, 2  ;;  %v3200_v27 = vpack.i.bf16 %v520_v5, %v518_v54  ;;  %v523_v34 = vsel %vm500_vm1, %v521_v16, %v522_v51 }
  0x37   : > { %v525_v2 = vsel %vm500_vm1, %v522_v51, %v524_v3  ;;  %v534_v57 = vrot.slane %v2985_v55, 2  ;;  %v3206_v13 = vpack.i.bf16 %v515_v30, %v513_v22  ;;  %v3208_v48 = vpack.i.bf16 %v530_v7, %v528_v6 }
  0x38   : > { %2205 = vrot.lane.b32.xlu0 %v3160_v4, %s2816_s23  ;;  %v546_v26 = vrot.slane %v2988_v56, 2  ;;  %v3211_v44 = vpack.i.bf16 %v525_v2, %v523_v34  ;;  %v538_v38 = vsel %vm500_vm1, %v536_v33, %v537_v37  ;;  %v540_v54 = vsel %vm500_vm1, %v537_v37, %v539_v8 }
  0x39   : > { %v533_v16 = vsel %vm500_vm1, %v531_v23, %v532_v45  ;;  %v535_v55 = vsel %vm500_vm1, %v532_v45, %v534_v57  ;;  %v547_v51 = vrot.slane %v2998_v61, 2  ;;  %v549_v3 = vrot.slane %v3001_v62, 2 }
  0x3a   : > { %2220 = vrot.lane.b32.xlu1 %v3180_v47, %s2817_s24  ;;  %v542_v5 = vrot.slane %v3011_v10, 2  ;;  %v544_v22 = vrot.slane %v3021_v21, 2  ;;  %v556_v33 = vrot.slane %v3028_v29, 2  ;;  %v557_v30 = vrot.slane %v3031_v32, 2  ;;  %v4264_v21 = vld [vmem:[#allocation9_spill] sm:$0xff] }
  0x3b   : > { %v559_v6 = vrot.slane %v3041_v39, 2  ;;  %v551_v7 = vrot.slane %v3044_v40, 2  ;;  %v552_v37 = vrot.slane %v3047_v41, 2  ;;  %v554_v62 = vrot.slane %v3053_v52, 2 }
  0x3c   : > { %2215 = vrot.lane.b32.xlu0 %v2214_v60, %s2817_s24  ;;  %v541_v60 = vrot.slane %v3008_v9, 2  ;;  %v566_v8 = vrot.slane %v3056_v53, 2  ;;  %v567_v23 = vrot.slane %v3066_v63, 2  ;;  %v569_v45 = vrot.slane %v4264_v21, 2 }
  0x3d   : > { %v3237_v34 = vpack.i.bf16 %v540_v54, %v538_v38  ;;  %v3239_v2 = vpack.i.bf16 %v535_v55, %v533_v16  ;;  %v548_v39 = vsel %vm500_vm1, %v546_v26, %v547_v51  ;;  %v550_v57 = vsel %vm500_vm1, %v547_v51, %v549_v3  ;;  %v4265_v16 = vld [vmem:[#allocation10_spill] sm:$0xff]  ;;  %v4266_v3 = vld [vmem:[#allocation11_spill] sm:$0xff] }
  0x3e   : > { %2230 = vrot.lane.b32.xlu1 %v3200_v27, %s2817_s24  ;;  %v543_v4 = vsel %vm500_vm1, %v541_v60, %v542_v5  ;;  %v545_v52 = vsel %vm500_vm1, %v542_v5, %v544_v22  ;;  %v558_v20 = vsel %vm500_vm1, %v556_v33, %v557_v30  ;;  %v560_v21 = vsel %vm500_vm1, %v557_v30, %v559_v6 }
  0x3f   : > { %v553_v38 = vsel %vm500_vm1, %v551_v7, %v552_v37  ;;  %v555_v54 = vsel %vm500_vm1, %v552_v37, %v554_v62  ;;  %v561_v55 = vrot.slane %v4265_v16, 2  ;;  %v568_v26 = vsel %vm500_vm1, %v566_v8, %v567_v23 }
  0x40   : > { %2225 = vrot.lane.b32.xlu0 %v3206_v13, %s2817_s24  ;;  %v570_v51 = vsel %vm500_vm1, %v567_v23, %v569_v45  ;;  %v562_v60 = vrot.slane %v4266_v3, 2  ;;  %v564_v5 = vrot.slane %v3089_v35, 2  ;;  %v3258_v22 = vpack.i.bf16 %v550_v57, %v548_v39 }
  0x41   : > { %v3260_v33 = vpack.i.bf16 %v545_v52, %v543_v4  ;;  %v3262_v30 = vpack.i.bf16 %v560_v21, %v558_v20  ;;  %v3264_v6 = vpack.i.bf16 %v555_v54, %v553_v38  ;;  %v3268_v7 = vpack.i.bf16 %v570_v51, %v568_v26  ;;  %v4267_v4 = vld [vmem:[#allocation14_spill] sm:$0xff] }
  0x42   : > { %2240 = vrot.lane.b32.xlu1 %v3208_v48, %s2817_s24  ;;  %v576_v37 = vrot.slane %v3096_v46, 2  ;;  %v577_v35 = vrot.slane %v3099_v59, 2  ;;  %v563_v62 = vsel %vm500_vm1, %v561_v55, %v562_v60  ;;  %v565_v8 = vsel %vm500_vm1, %v562_v60, %v564_v5 }
  0x43   : > { %v579_v20 = vrot.slane %v3109_v14, 2  ;;  %v571_v23 = vrot.slane %v4267_v4, 2  ;;  %v572_v45 = vrot.slane %v3115_v19, 2  ;;  %v574_v39 = vrot.slane %v3121_v58, 2 }
  0x44   : > { %2235 = vrot.lane.b32.xlu0 %v3211_v44, %s2817_s24  ;;  %v3284_v57 = vpack.i.bf16 %v565_v8, %v563_v62  ;;  %v578_v52 = vsel %vm500_vm1, %v576_v37, %v577_v35  ;;  %v2299_v55 = vpack.i.bf16 %v2882_v1, %v2879_v0  ;;  %v2294_v26 = vpack.i.bf16 %v2917_v18, %v2914_v17 }
  0x45   : > { %v580_v21 = vsel %vm500_vm1, %v577_v35, %v579_v20  ;;  %v573_v14 = vsel %vm500_vm1, %v571_v23, %v572_v45  ;;  %v575_v38 = vsel %vm500_vm1, %v572_v45, %v574_v39  ;;  %v2309_v51 = vpack.i.bf16 %v2949_v36, %v2941_v31 }
  0x46   : > { %2250 = vrot.lane.b32.xlu1 %v3237_v34, %s2817_s24  ;;  %v3294_v58 = vpack.i.bf16 %v580_v21, %v578_v52  ;;  %v3298_v54 = vpack.i.bf16 %v575_v38, %v573_v14  ;;  %v2304_v60 = vpack.i.bf16 %v2905_v12, %v2902_v11  ;;  %v3317_v0 = vpack.i.bf16 %v2977_v50, %v2974_v49  ;;  %v4273_v52 = vld [vmem:[#allocation6_spill] sm:$0xff] }
  0x47   : > { %v3322_v1 = vpack.i.bf16 %v2931_v25, %v2928_v24  ;;  %v2329_v17 = vpack.i.bf16 %v3011_v10, %v3008_v9  ;;  %v3332_v11 = vpack.i.bf16 %v2962_v43, %v2959_v42  ;;  %v2339_v12 = vpack.i.bf16 %v3047_v41, %v3044_v40  ;;  %v4268_v40 = vld [vmem:[#allocation4_spill] sm:$0xff] }
  0x48   : > { %2245 = vrot.lane.b32.xlu0 %v3239_v2, %s2817_s24  ;;  %v2334_v18 = vpack.i.bf16 %v2998_v61, %v2988_v56  ;;  %v2349_v9 = vpack.i.bf16 %v4266_v3, %v4265_v16  ;;  %v2344_v10 = vpack.i.bf16 %v3031_v32, %v3028_v29  ;;  %v4269_v56 = vld [vmem:[#allocation12_spill] sm:$0xff]  ;;  %v4270_v61 = vld [vmem:[#allocation2_spill] sm:$0xff] }
  0x4a   : > { %2260 = vrot.lane.b32.xlu1 %v3258_v22, %s2817_s24 }
  0x4c   : > { %2255 = vrot.lane.b32.xlu0 %v3260_v33, %s2817_s24 }
  0x4e   : > { %2270 = vrot.lane.b32.xlu1 %v3262_v30, %s2817_s24 }
  0x50   : > { %2265 = vrot.lane.b32.xlu0 %v3264_v6, %s2817_s24 }
  0x52   : > { %2280 = vrot.lane.b32.xlu1 %v3268_v7, %s2817_s24 }
  0x54   : > { %2275 = vrot.lane.b32.xlu0 %v3284_v57, %s2817_s24 }
  0x56   : > { %2290 = vrot.lane.b32.xlu1 %v3294_v58, %s2817_s24 }
  0x58   : > { %2285 = vrot.lane.b32.xlu0 %v3298_v54, %s2817_s24  ;;  %s316_s24 = scalar_lea.vmem %s4214_s4, %s1997_s21 }
  0x5a   : > { %2300 = vrot.lane.b32.xlu1 %v2299_v55, %s2818_s25 }
  0x5c   : > { %2295 = vrot.lane.b32.xlu0 %v2294_v26, %s2818_s25 }
  0x5e   : > { %2310 = vrot.lane.b32.xlu1 %v2309_v51, %s2818_s25 }
  0x60   : > { %2305 = vrot.lane.b32.xlu0 %v2304_v60, %s2818_s25 }
  0x62   : > { %2320 = vrot.lane.b32.xlu1 %v3317_v0, %s2818_s25 }
  0x64   : > { %2315 = vrot.lane.b32.xlu0 %v3322_v1, %s2818_s25 }
  0x66   : > { %2330 = vrot.lane.b32.xlu1 %v2329_v17, %s2818_s25 }
  0x68   : > { %2325 = vrot.lane.b32.xlu0 %v3332_v11, %s2818_s25 }
  0x6a   : > { %2340 = vrot.lane.b32.xlu1 %v2339_v12, %s2818_s25 }
  0x6c   : > { %2335 = vrot.lane.b32.xlu0 %v2334_v18, %s2818_s25  ;;  %v2524_v18 = vpack.i.bf16 %v3066_v63, %v3056_v53 }
  0x6e   : > { %2350 = vrot.lane.b32.xlu1 %v2349_v9, %s2818_s25 }
  0x70   : > { %2345 = vrot.lane.b32.xlu0 %v2344_v10, %s2818_s25 }
  0x72   : > { %2360 = vrot.lane.b32.xlu1 %v4268_v40, %s2819_s26 }
  0x74   : > { %2355 = vrot.lane.b32.xlu0 %v4269_v56, %s2819_s26 }
  0x76   : > { %2370 = vrot.lane.b32.xlu1 %v3180_v47, %s2820_s27 }
  0x78   : > { %2365 = vrot.lane.b32.xlu0 %v3258_v22, %s2820_s27 }
  0x7a   : > { %2380 = vrot.lane.b32.xlu1 %v2299_v55, %s2821_s28 }
  0x7c   : > { %2375 = vrot.lane.b32.xlu0 %v2339_v12, %s2821_s28 }
  0x7e   : > { %2390 = vrot.lane.b32.xlu1 %v4270_v61, %s2822_s29 }
  0x80   : > { %2385 = vrot.lane.b32.xlu0 %v3127_v15, %s2822_s29 }
  0x82   : > { %2400 = vrot.lane.b32.xlu1 %v3206_v13, %s2823_s30 }
  0x84   : > { %2395 = vrot.lane.b32.xlu0 %v3264_v6, %s2823_s30 }
  0x86   : > { %2410 = vrot.lane.b32.xlu1 %v4270_v61, %s2819_s26 }
  0x88   : > { %2405 = vrot.lane.b32.xlu0 %v3127_v15, %s2819_s26  ;;  %v4271_v15 = vld [vmem:[#allocation3_spill] sm:$0xff] }
  0x8a   : > { %2420 = vrot.lane.b32.xlu1 %v3206_v13, %s2820_s27  ;;  %v4272_v13 = vld [vmem:[#allocation15_spill] sm:$0xff] }
  0x8c   : > { %2415 = vrot.lane.b32.xlu0 %v3264_v6, %s2820_s27  ;;  %v3375_v29 = vpop.permute.xlu1 %2145 }
  0x8e   : > { %v3377_v32 = vpop.permute.xlu0 %2135  ;;  %2430 = vrot.lane.b32.xlu1 %v2304_v60, %s2821_s28 }
  0x90   : > { %2425 = vrot.lane.b32.xlu0 %v2344_v10, %s2821_s28  ;;  %v3381_v41 = vpop.permute.xlu1 %2150 }
  0x92   : > { %v3383_v47 = vpop.permute.xlu0 %2140  ;;  %2440 = vrot.lane.b32.xlu1 %v4271_v15, %s2822_s29 }
  0x94   : > { %2435 = vrot.lane.b32.xlu0 %v4272_v13, %s2822_s29  ;;  %v2161_v5 = vpop.permute.xlu1 %2160 }
  0x95   : > { %v2163_v55 = vunpack.i.h.bf16 %v2161_v5  ;;  %v2162_v26 = vunpack.i.l.bf16 %v2161_v5 }
  0x96   : > { %v2156_v6 = vpop.permute.xlu0 %2155  ;;  %2450 = vrot.lane.b32.xlu1 %v3200_v27, %s2823_s30 }
  0x97   : > { %v2158_v60 = vunpack.i.h.bf16 %v2156_v6  ;;  %v2157_v17 = vunpack.i.l.bf16 %v2156_v6  ;;  %v1387_v10 = vsel %vm1375_vm2, %v2931_v25, %v2163_v55  ;;  %v1386_v40 = vsel %vm1375_vm2, %v2928_v24, %v2162_v26 }
  0x98   : > { %2445 = vrot.lane.b32.xlu0 %v3262_v30, %s2823_s30  ;;  %v2171_v37 = vpop.permute.xlu1 %2170 }
  0x99   : > { %v2172_v61 = vunpack.i.l.bf16 %v2171_v37  ;;  %v1385_v25 = vsel %vm1375_vm2, %v2949_v36, %v2158_v60  ;;  %v1384_v24 = vsel %vm1375_vm2, %v2941_v31, %v2157_v17 }
  0x9a   : > { %v3393_v35 = vpop.permute.xlu0 %2165  ;;  %2460 = vrot.lane.b32.xlu1 %v4271_v15, %s2819_s26 }
  0x9b   : > { %v1390_v31 = vsel %vm1375_vm2, %v2959_v42, %v2172_v61  ;;  %v4275_v42 = vld [vmem:[#allocation16_spill] sm:$0xff] }
  0x9c   : > { %2455 = vrot.lane.b32.xlu0 %v4272_v13, %s2819_s26  ;;  %v3399_v62 = vpop.permute.xlu1 %2180 }
  0x9e   : > { %v3401_v8 = vpop.permute.xlu0 %2175  ;;  %2470 = vrot.lane.b32.xlu1 %v3200_v27, %s2820_s27 }
  0xa0   : > { %2465 = vrot.lane.b32.xlu0 %v3262_v30, %s2820_s27  ;;  %v3407_v20 = vpop.permute.xlu1 %2190 }
  0xa2   : > { %v3409_v23 = vpop.permute.xlu0 %2185  ;;  %2480 = vrot.lane.b32.xlu1 %v2309_v51, %s2821_s28 }
  0xa4   : > { %2475 = vrot.lane.b32.xlu0 %v2349_v9, %s2821_s28  ;;  %v3413_v45 = vpop.permute.xlu1 %2200 }
  0xa6   : > { %v3415_v39 = vpop.permute.xlu0 %2195  ;;  %2490 = vrot.lane.b32.xlu1 %v4273_v52, %s2822_s29 }
  0xa8   : > { %2485 = vrot.lane.b32.xlu0 %v3155_v28, %s2822_s29  ;;  %v3421_v27 = vpop.permute.xlu1 %2210 }
  0xaa   : > { %v3423_v30 = vpop.permute.xlu0 %2205  ;;  %2500 = vrot.lane.b32.xlu1 %v3211_v44, %s2823_s30 }
  0xac   : > { %2495 = vrot.lane.b32.xlu0 %v3284_v57, %s2823_s30  ;;  %v3429_v21 = vpop.permute.xlu1 %2220 }
  0xae   : > { %v3431_v14 = vpop.permute.xlu0 %2215  ;;  %2510 = vrot.lane.b32.xlu1 %v4273_v52, %s2819_s26  ;;  %v2167_v52 = vunpack.i.l.bf16 %v3393_v35 }
  0xb0   : > { %2505 = vrot.lane.b32.xlu0 %v3155_v28, %s2819_s26  ;;  %v3437_v38 = vpop.permute.xlu1 %2230 }
  0xb2   : > { %v3439_v51 = vpop.permute.xlu0 %2225  ;;  %2520 = vrot.lane.b32.xlu1 %v3211_v44, %s2820_s27  ;;  %v2173_v44 = vunpack.i.h.bf16 %v2171_v37  ;;  %v2168_v37 = vunpack.i.h.bf16 %v3393_v35  ;;  %v4274_v35 = vld [vmem:[#allocation5_spill] sm:$0xff] }
  0xb4   : > { %2515 = vrot.lane.b32.xlu0 %v3284_v57, %s2820_s27  ;;  %v2241_v12 = vpop.permute.xlu1 %2240  ;;  %v1391_v36 = vsel %vm1375_vm2, %v2962_v43, %v2173_v44  ;;  %v1388_v43 = vsel %vm1375_vm2, %v2974_v49, %v2167_v52  ;;  %v2197_v52 = vunpack.i.l.bf16 %v3415_v39 }
  0xb5   : > { %v2243_v28 = vunpack.i.h.bf16 %v2241_v12  ;;  %v2242_v9 = vunpack.i.l.bf16 %v2241_v12 }
  0xb6   : > { %v2236_v15 = vpop.permute.xlu0 %2235  ;;  %2530 = vrot.lane.b32.xlu1 %v3322_v1, %s2821_s28 }
  0xb7   : > { %v3454_v57 = vsel %vm1408_vm3, %v1387_v10, %v2243_v28  ;;  %v3457_v13 = vsel %vm1408_vm3, %v1386_v40, %v2242_v9  ;;  %v2238_v5 = vunpack.i.h.bf16 %v2236_v15  ;;  %v2237_v6 = vunpack.i.l.bf16 %v2236_v15 }
  0xb8   : > { %2525 = vrot.lane.b32.xlu0 %v2524_v18, %s2821_s28  ;;  %v2251_v1 = vpop.permute.xlu1 %2250  ;;  %v1389_v15 = vsel %vm1375_vm2, %v2977_v50, %v2168_v37  ;;  %v2203_v50 = vunpack.i.h.bf16 %v3413_v45  ;;  %v2198_v37 = vunpack.i.h.bf16 %v3415_v39 }
  0xb9   : > { %v3467_v55 = vsel %vm1408_vm3, %v1384_v24, %v2237_v6  ;;  %v3470_v26 = vsel %vm1408_vm3, %v1385_v25, %v2238_v5  ;;  %v2253_v12 = vunpack.i.h.bf16 %v2251_v1  ;;  %v2252_v28 = vunpack.i.l.bf16 %v2251_v1 }
  0xba   : > { %v2246_v60 = vpop.permute.xlu0 %2245  ;;  %2540 = vrot.lane.b32.xlu1 %v4274_v35, %s2822_s29  ;;  %v2202_v25 = vunpack.i.l.bf16 %v3413_v45  ;;  %v1403_v45 = vsel %vm1375_vm2, %v3066_v63, %v2203_v50  ;;  %v1401_v63 = vsel %vm1375_vm2, %v4266_v3, %v2198_v37 }
  0xbb   : > { %v3479_v17 = vsel %vm1408_vm3, %v1391_v36, %v2253_v12  ;;  %v3482_v9 = vsel %vm1408_vm3, %v1390_v31, %v2252_v28  ;;  %v2248_v10 = vunpack.i.h.bf16 %v2246_v60  ;;  %v2247_v40 = vunpack.i.l.bf16 %v2246_v60 }
  0xbc   : > { %2535 = vrot.lane.b32.xlu0 %v4275_v42, %s2822_s29  ;;  %v3490_v44 = vpop.permute.xlu1 %2260  ;;  %v2579_v36 = vpack.i.bf16 %v3115_v19, %v4267_v4  ;;  %v1402_v31 = vsel %vm1375_vm2, %v3056_v53, %v2202_v25  ;;  %v2213_v60 = vunpack.i.h.bf16 %v3421_v27  ;;  %v1400_v53 = vsel %vm1375_vm2, %v4265_v16, %v2197_v52 }
  0xbd   : > { %v3493_v61 = vsel %vm1408_vm3, %v1388_v43, %v2247_v40  ;;  %v3496_v5 = vsel %vm1408_vm3, %v1389_v15, %v2248_v10  ;;  %v2212_v10 = vunpack.i.l.bf16 %v3421_v27  ;;  %v2208_v27 = vunpack.i.h.bf16 %v3423_v30 }
  0xbe   : > { %v3498_v6 = vpop.permute.xlu0 %2255  ;;  %2550 = vrot.lane.b32.xlu1 %v3208_v48, %s2823_s30  ;;  %v1407_v3 = vsel %vm1375_vm2, %v3099_v59, %v2213_v60 }
  0xbf   : > { %v1406_v16 = vsel %vm1375_vm2, %v3096_v46, %v2212_v10 }
  0xc0   : > { %2545 = vrot.lane.b32.xlu0 %v3268_v7, %s2823_s30  ;;  %v3504_v49 = vpop.permute.xlu1 %2270 }
  0xc2   : > { %v3508_v24 = vpop.permute.xlu0 %2265  ;;  %2560 = vrot.lane.b32.xlu1 %v4275_v42, %s2819_s26  ;;  %v2207_v42 = vunpack.i.l.bf16 %v3423_v30 }
  0xc4   : > { %2555 = vrot.lane.b32.xlu0 %v2524_v18, %s2818_s25  ;;  %v2281_v1 = vpop.permute.xlu1 %2280 }
  0xc5   : > { %v2283_v12 = vunpack.i.h.bf16 %v2281_v1  ;;  %v2282_v28 = vunpack.i.l.bf16 %v2281_v1 }
  0xc6   : > { %v2276_v40 = vpop.permute.xlu0 %2275  ;;  %2570 = vrot.lane.b32.xlu1 %v3268_v7, %s2820_s27 }
  0xc7   : > { %v3526_v39 = vsel %vm1408_vm3, %v1403_v45, %v2283_v12  ;;  %v3529_v18 = vsel %vm1408_vm3, %v1402_v31, %v2282_v28  ;;  %v2278_v15 = vunpack.i.h.bf16 %v2276_v40  ;;  %v2277_v43 = vunpack.i.l.bf16 %v2276_v40 }
  0xc8   : > { %4276 = vst [vmem:[#allocation9_spill] sm:$0xff] %v3529_v18  ;;  %2565 = vrot.lane.b32.xlu0 %v4274_v35, %s2819_s26  ;;  %v2291_v7 = vpop.permute.xlu1 %2290  ;;  %v1405_v45 = vsel %vm1375_vm2, %v3115_v19, %v2208_v27  ;;  %v1404_v31 = vsel %vm1375_vm2, %v4267_v4, %v2207_v42 }
  0xc9   : > { %v3540_v50 = vsel %vm1408_vm3, %v1400_v53, %v2277_v43  ;;  %v3543_v25 = vsel %vm1408_vm3, %v1401_v63, %v2278_v15  ;;  %v2293_v1 = vunpack.i.h.bf16 %v2291_v7  ;;  %v2292_v12 = vunpack.i.l.bf16 %v2291_v7  ;;  %v4281_v43 = vld [vmem:[#allocation18_spill] sm:$0xff] }
  0xca   : > { %v2286_v37 = vpop.permute.xlu0 %2285  ;;  %2580 = vrot.lane.b32.xlu1 %v2579_v36, %s2821_s28 }
  0xcb   : > { %v3551_v30 = vsel %vm1408_vm3, %v1407_v3, %v2293_v1  ;;  %v3554_v35 = vsel %vm1408_vm3, %v1406_v16, %v2292_v12  ;;  %v2288_v52 = vunpack.i.h.bf16 %v2286_v37  ;;  %v2287_v28 = vunpack.i.l.bf16 %v2286_v37 }
  0xcc   : > { %4277 = vst [vmem:[#allocation10_spill] sm:$0xff] %v3551_v30  ;;  %4278 = vst [vmem:[#allocation11_spill] sm:$0xff] %v3554_v35  ;;  %2575 = vrot.lane.b32.xlu0 %v3208_v48, %s2820_s27  ;;  %v3562_v60 = vpop.permute.xlu1 %2300  ;;  %v4282_v48 = vld [vmem:[#allocation8_spill] sm:$0xff]  ;;  %v2258_v30 = vunpack.i.h.bf16 %v3498_v6 }
  0xcd   : > { %v3565_v10 = vsel %vm1408_vm3, %v1404_v31, %v2287_v28  ;;  %v3568_v40 = vsel %vm1408_vm3, %v1405_v45, %v2288_v52 }
  0xce   : > { %4279 = vst [vmem:[#allocation14_spill] sm:$0xff] %v3565_v10  ;;  %4280 = vst [vmem:[#allocation4_spill] sm:$0xff] %v3568_v40  ;;  %v3570_v15 = vpop.permute.xlu0 %2295  ;;  %2590 = vrot.lane.b32.xlu1 %v4281_v43, %s2822_s29 }
  0xd0   : > { %2585 = vrot.lane.b32.xlu0 %v3317_v0, %s2821_s28  ;;  %v3576_v19 = vpop.permute.xlu1 %2310 }
  0xd2   : > { %v3578_v4 = vpop.permute.xlu0 %2305  ;;  %2600 = vrot.lane.b32.xlu1 %v3298_v54, %s2823_s30 }
  0xd4   : > { %2595 = vrot.lane.b32.xlu0 %v4282_v48, %s2822_s29  ;;  %v2321_v63 = vpop.permute.xlu1 %2320 }
  0xd5   : > { %v2323_v53 = vunpack.i.h.bf16 %v2321_v63  ;;  %v2322_v27 = vunpack.i.l.bf16 %v2321_v63  ;;  %v367_v63 = vld [vmem:[%s3622_s8 + $0x10] sm:$0x3] }
  0xd6   : > { %v2316_v42 = vpop.permute.xlu0 %2315  ;;  %2610 = vrot.lane.b32.xlu1 %v2579_v36, %s2818_s25 }
  0xd7   : > { %v3587_v0 = vsel %vm1441_vm4, %v3457_v13, %v2322_v27  ;;  %v3591_v7 = vsel %vm1441_vm4, %v3454_v57, %v2323_v53  ;;  %v2318_v1 = vunpack.i.h.bf16 %v2316_v42  ;;  %v2317_v12 = vunpack.i.l.bf16 %v2316_v42 }
  0xd8   : > { %4283 = vst [vmem:[#allocation12_spill] sm:$0xff] %v3587_v0  ;;  %4284 = vst [vmem:[#allocation2_spill] sm:$0xff] %v3591_v7  ;;  %2605 = vrot.lane.b32.xlu0 %v3239_v2, %s2823_s30  ;;  %v2331_v3 = vpop.permute.xlu1 %2330 }
  0xd9   : > { %v3597_v16 = vsel %vm1441_vm4, %v3467_v55, %v2317_v12  ;;  %v3601_v36 = vsel %vm1441_vm4, %v3470_v26, %v2318_v1  ;;  %v2333_v13 = vunpack.i.h.bf16 %v2331_v3  ;;  %v2332_v37 = vunpack.i.l.bf16 %v2331_v3 }
  0xda   : > { %v2326_v57 = vpop.permute.xlu0 %2325  ;;  %2620 = vrot.lane.b32.xlu1 %v4282_v48, %s2819_s26  ;;  %v366_v48 = vld [vmem:[%s3622_s8 + $0x8] sm:$0xff]  ;;  %v592_v3 = vrot.slane %v367_v63, 2 }
  0xdb   : > { %v3609_v52 = vsel %vm1441_vm4, %v3482_v9, %v2332_v37  ;;  %v3613_v55 = vsel %vm1441_vm4, %v3479_v17, %v2333_v13  ;;  %v2328_v28 = vunpack.i.h.bf16 %v2326_v57  ;;  %v2327_v45 = vunpack.i.l.bf16 %v2326_v57 }
  0xdc   : > { %4285 = vst [vmem:[#allocation3_spill] sm:$0xff] %v3609_v52  ;;  %4286 = vst [vmem:[#allocation15_spill] sm:$0xff] %v3613_v55  ;;  %2615 = vrot.lane.b32.xlu0 %v4281_v43, %s2819_s26  ;;  %v3617_v26 = vpop.permute.xlu1 %2340  ;;  %v365_v43 = vld [vmem:[%s3622_s8] sm:$0xff]  ;;  %v585_v42 = vrot.slane %v366_v48, 1  ;;  %v590_v12 = vrot.slane %v366_v48, 2  ;;  %v2138_v37 = vunpack.i.h.bf16 %v3377_v32  ;;  %v2137_v57 = vunpack.i.l.bf16 %v3377_v32  ;;  %v4290_v52 = vld [vmem:[#allocation17_spill] sm:$0xff] }
  0xdd   : > { %v3626_v9 = vsel %vm1441_vm4, %v3493_v61, %v2327_v45  ;;  %v3630_v17 = vsel %vm1441_vm4, %v3496_v5, %v2328_v28  ;;  %v3645_v61 = vpack.i.bf16 %v3099_v59, %v3096_v46  ;;  %v584_v5 = vrot.slane %v365_v43, 1  ;;  %v4289_v46 = vld [vmem:[#allocation7_spill] sm:$0xff] }
  0xde   : > { %4287 = vst [vmem:[#allocation6_spill] sm:$0xff] %v3626_v9  ;;  %4288 = vst [vmem:[#allocation5_spill] sm:$0xff] %v3630_v17  ;;  %v3632_v31 = vpop.permute.xlu0 %2335  ;;  %2630 = vrot.lane.b32.xlu1 %v3239_v2, %s2820_s27  ;;  %v587_v2 = vrot.slane %v367_v63, 1  ;;  %v3663_v28 = vpack.i.bf16 %v366_v48, %v365_v43  ;;  %v2178_v45 = vunpack.i.h.bf16 %v3401_v8  ;;  %v2177_v63 = vunpack.i.l.bf16 %v3401_v8  ;;  %v3681_v8 = vld [vmem:[%s2876_s22 + $0xc8] sm:$0xff] }
  0xdf   : > { %v586_v59 = vsel %vm419_vm0, %v584_v5, %v585_v42  ;;  %v2218_v32 = vunpack.i.h.bf16 %v3431_v14  ;;  %v2338_v40 = vunpack.i.h.bf16 %v3632_v31  ;;  %v2337_v10 = vunpack.i.l.bf16 %v3632_v31 }
  0xe0   : > { %2625 = vrot.lane.b32.xlu0 %v3298_v54, %s2820_s27  ;;  %v3641_v53 = vpop.permute.xlu1 %2350  ;;  %v589_v54 = vrot.slane %v365_v43, 2  ;;  %v2217_v43 = vunpack.i.l.bf16 %v3431_v14  ;;  %v2778_v14 = vld [vmem:[%s2876_s22 + $0x8] sm:$0xff] }
  0xe2   : > { %v3647_v27 = vpop.permute.xlu0 %2345  ;;  %2640 = vrot.lane.b32.xlu1 %v3332_v11, %s2821_s28  ;;  %v588_v11 = vsel %vm419_vm0, %v585_v42, %v587_v2  ;;  %v591_v5 = vsel %vm500_vm1, %v589_v54, %v590_v12  ;;  %v593_v42 = vsel %vm500_vm1, %v590_v12, %v592_v3  ;;  %v3678_v2 = vld [vmem:[%s2876_s22 + $0xc0] sm:$0xff]  ;;  %v2257_v54 = vunpack.i.l.bf16 %v3498_v6 }
  0xe3   : > { %v3675_v48 = vpack.i.bf16 %v588_v11, %v586_v59  ;;  %v2298_v12 = vunpack.i.h.bf16 %v3570_v15  ;;  %v2297_v3 = vunpack.i.l.bf16 %v3570_v15  ;;  %v1377_v59 = vsel %vm1375_vm2, %v2778_v14, %v2138_v37  ;;  %v2779_v11 = vld [vmem:[%s2876_s22] sm:$0xff] }
  0xe4   : > { %2635 = vrot.lane.b32.xlu0 %v3645_v61, %s2821_s28  ;;  %v3653_v1 = vpop.permute.xlu1 %2360  ;;  %v1376_v9 = vsel %vm1375_vm2, %v2779_v11, %v2137_v57  ;;  %v3695_v35 = vpack.i.bf16 %v593_v42, %v591_v5  ;;  %v1393_v6 = vsel %vm1375_vm2, %v3681_v8, %v2178_v45  ;;  %v1392_v15 = vsel %vm1375_vm2, %v3678_v2, %v2177_v63 }
  0xe5   : > { %v1409_v57 = vsel %vm1408_vm3, %v1376_v9, %v2217_v43  ;;  %v1410_v5 = vsel %vm1408_vm3, %v1377_v59, %v2218_v32  ;;  %v2363_v42 = vunpack.i.h.bf16 %v3653_v1  ;;  %v2362_v45 = vunpack.i.l.bf16 %v3653_v1 }
  0xe6   : > { %v3655_v13 = vpop.permute.xlu0 %2355  ;;  %2650 = vrot.lane.b32.xlu1 %v4289_v46, %s2822_s29  ;;  %v1425_v14 = vsel %vm1408_vm3, %v1392_v15, %v2257_v54  ;;  %v1426_v63 = vsel %vm1408_vm3, %v1393_v6, %v2258_v30  ;;  %v1442_v11 = vsel %vm1441_vm4, %v1409_v57, %v2297_v3  ;;  %v1443_v31 = vsel %vm1441_vm4, %v1410_v5, %v2298_v12 }
  0xe7   : > { %v2358_v9 = vunpack.i.h.bf16 %v3655_v13  ;;  %v2357_v32 = vunpack.i.l.bf16 %v3655_v13  ;;  %v1458_v54 = vsel %vm1441_vm4, %v1425_v14, %v2337_v10  ;;  %v1459_v30 = vsel %vm1441_vm4, %v1426_v63, %v2338_v40 }
  0xe8   : > { %2645 = vrot.lane.b32.xlu0 %v4290_v52, %s2822_s29  ;;  %v3669_v55 = vpop.permute.xlu1 %2370  ;;  %v1476_v6 = vsel %vm1474_vm5, %v1443_v31, %v2363_v42 }
  0xe9   : > { %v2373_v43 = vunpack.i.h.bf16 %v3669_v55  ;;  %v2372_v1 = vunpack.i.l.bf16 %v3669_v55  ;;  %v1491_v10 = vsel %vm1474_vm5, %v1458_v54, %v2357_v32  ;;  %v1492_v40 = vsel %vm1474_vm5, %v1459_v30, %v2358_v9 }
  0xea   : > { %v2366_v17 = vpop.permute.xlu0 %2365  ;;  %2660 = vrot.lane.b32.xlu1 %v3237_v34, %s2823_s30 }
  0xeb   : > { %v2368_v3 = vunpack.i.h.bf16 %v2366_v17  ;;  %v2367_v59 = vunpack.i.l.bf16 %v2366_v17 }
  0xec   : > { %2655 = vrot.lane.b32.xlu0 %v3294_v58, %s2823_s30  ;;  %v2381_v37 = vpop.permute.xlu1 %2380 }
  0xed   : > { %v2383_v15 = vunpack.i.h.bf16 %v2381_v37  ;;  %v2382_v13 = vunpack.i.l.bf16 %v2381_v37  ;;  %v1524_v42 = vsel %vm1507_vm6, %v1491_v10, %v2367_v59  ;;  %v1525_v37 = vsel %vm1507_vm6, %v1492_v40, %v2368_v3 }
  0xee   : > { %v2376_v0 = vpop.permute.xlu0 %2375  ;;  %2670 = vrot.lane.b32.xlu1 %v4290_v52, %s2819_s26  ;;  %v1475_v52 = vsel %vm1474_vm5, %v1442_v11, %v2362_v45  ;;  %v2143_v10 = vunpack.i.h.bf16 %v3383_v47  ;;  %v2142_v40 = vunpack.i.l.bf16 %v3383_v47  ;;  %v3787_v47 = vld [vmem:[%s2876_s22 + $0xe0] sm:$0xff] }
  0xef   : > { %v2378_v57 = vunpack.i.h.bf16 %v2376_v0  ;;  %v2377_v5 = vunpack.i.l.bf16 %v2376_v0  ;;  %v1508_v17 = vsel %vm1507_vm6, %v1475_v52, %v2372_v1 }
  0xf0   : > { %2665 = vrot.lane.b32.xlu0 %v3645_v61, %s2818_s25  ;;  %v2391_v12 = vpop.permute.xlu1 %2390  ;;  %v1509_v61 = vsel %vm1507_vm6, %v1476_v6, %v2373_v43  ;;  %v3755_v6 = vld [vmem:[%s3622_s8 + $0x20] sm:$0xff] }
  0xf1   : > { %v2393_v7 = vunpack.i.h.bf16 %v2391_v12  ;;  %v2392_v55 = vunpack.i.l.bf16 %v2391_v12  ;;  %v1542_v63 = vsel %vm1540_vm7, %v1509_v61, %v2383_v15  ;;  %v1557_v9 = vsel %vm1540_vm7, %v1524_v42, %v2377_v5 }
  0xf2   : > { %v2386_v18 = vpop.permute.xlu0 %2385  ;;  %2680 = vrot.lane.b32.xlu1 %v3294_v58, %s2820_s27  ;;  %v1541_v58 = vsel %vm1540_vm7, %v1508_v17, %v2382_v13  ;;  %v1558_v32 = vsel %vm1540_vm7, %v1525_v37, %v2378_v57  ;;  %v598_v17 = vrot.slane %v3755_v6, 1  ;;  %v2183_v42 = vunpack.i.h.bf16 %v3399_v62 }
  0xf3   : > { %v2388_v45 = vunpack.i.h.bf16 %v2386_v18  ;;  %v2387_v0 = vunpack.i.l.bf16 %v2386_v18  ;;  %v1574_v43 = vsel %vm1573_vm8, %v1541_v58, %v2392_v55  ;;  %v1575_v18 = vsel %vm1573_vm8, %v1542_v63, %v2393_v7  ;;  %v3752_v7 = vld [vmem:[%s3622_s8 + $0x18] sm:$0xff]  ;;  %v3794_v63 = vld [vmem:[%s3622_s8 + $0x28] sm:$0x3] }
  0xf4   : > { %2675 = vrot.lane.b32.xlu0 %v4289_v46, %s2819_s26  ;;  %v2401_v14 = vpop.permute.xlu1 %2400  ;;  %v597_v61 = vrot.slane %v3752_v7, 1  ;;  %v2182_v37 = vunpack.i.l.bf16 %v3399_v62 }
  0xf5   : > { %v2403_v11 = vunpack.i.h.bf16 %v2401_v14  ;;  %v2402_v31 = vunpack.i.l.bf16 %v2401_v14  ;;  %v1590_v12 = vsel %vm1573_vm8, %v1557_v9, %v2387_v0  ;;  %v1591_v52 = vsel %vm1573_vm8, %v1558_v32, %v2388_v45  ;;  %v3784_v14 = vld [vmem:[%s2876_s22 + $0xd8] sm:$0xff] }
  0xf6   : > { %v2396_v1 = vpop.permute.xlu0 %2395  ;;  %2690 = vrot.lane.b32.xlu1 %v3663_v28, %s2821_s28  ;;  %v4293_v45 = vpack.i.bf16 %v3681_v8, %v3678_v2  ;;  %v2749_v58 = vpack.i.bf16 %v3787_v47, %v3784_v14  ;;  %v2223_v2 = vunpack.i.h.bf16 %v3429_v21  ;;  %v2222_v8 = vunpack.i.l.bf16 %v3429_v21 }
  0xf7   : > { %v2398_v46 = vunpack.i.h.bf16 %v2396_v1  ;;  %v2397_v54 = vunpack.i.l.bf16 %v2396_v1  ;;  %v1607_v30 = vsel %vm1606_vm9, %v1574_v43, %v2402_v31  ;;  %v1608_v3 = vsel %vm1606_vm9, %v1575_v18, %v2403_v11  ;;  %v2782_v1 = vld [vmem:[%s2876_s22 + $0x20] sm:$0xff] }
  0xf8   : > { %2685 = vrot.lane.b32.xlu0 %v3237_v34, %s2820_s27  ;;  %v3747_v59 = vpop.permute.xlu1 %2410  ;;  %v2037_v57 = vpack.c.bf16 %v1608_v3, %v1607_v30  ;;  %v603_v11 = vrot.slane %v3755_v6, 2  ;;  %v602_v31 = vrot.slane %v3752_v7, 2  ;;  %v2263_v9 = vunpack.i.h.bf16 %v3490_v44 }
  0xf9   : > { %v1623_v15 = vsel %vm1606_vm9, %v1590_v12, %v2397_v54  ;;  %v1624_v13 = vsel %vm1606_vm9, %v1591_v52, %v2398_v46  ;;  %v2262_v32 = vunpack.i.l.bf16 %v3490_v44  ;;  %v2303_v43 = vunpack.i.h.bf16 %v3562_v60  ;;  %v2783_v54 = vld [vmem:[%s2876_s22 + $0x18] sm:$0xff] }
  0xfa   : > { %v3765_v5 = vpop.permute.xlu0 %2405  ;;  %2700 = vrot.lane.b32.xlu1 %v3675_v48, %s2822_s29  ;;  %v2034_v55 = vpack.c.bf16 %v1624_v13, %v1623_v15  ;;  %v2302_v18 = vunpack.i.l.bf16 %v3562_v60  ;;  %v1379_v46 = vsel %vm1375_vm2, %v2782_v1, %v2143_v10  ;;  %v1378_v30 = vsel %vm1375_vm2, %v2783_v54, %v2142_v40  ;;  %v4294_v13 = vld [vmem:[#allocation13_spill] sm:$0xff] }
  0xfb   : > { %v3819_v44 = vsel %vm419_vm0, %v597_v61, %v598_v17  ;;  %v600_v60 = vrot.slane %v3794_v63, 1  ;;  %v1395_v3 = vsel %vm1375_vm2, %v3787_v47, %v2183_v42  ;;  %v1394_v12 = vsel %vm1375_vm2, %v3784_v14, %v2182_v37 }
  0xfc   : > { %2695 = vrot.lane.b32.xlu0 %v4293_v45, %s2821_s28  ;;  %2036 = vmatprep.subr.msk.bf16.mxu0 %vm3761_vm11, %v2034_v55  ;;  %v3781_v0 = vpop.permute.xlu1 %2420  ;;  %v2343_v52 = vunpack.i.h.bf16 %v3617_v26  ;;  %v2342_v15 = vunpack.i.l.bf16 %v3617_v26  ;;  %v1412_v10 = vsel %vm1408_vm3, %v1379_v46, %v2223_v2  ;;  %v2413_v40 = vunpack.i.h.bf16 %v3747_v59 }
  0xfd   : > { %2082 = vmatprep.subr.msk.bf16.mxu1 %vm3761_vm11, %v2034_v55  ;;  %2039 = vmatpush3.bf16.xpose.msk.msra.mxu0 %vm3761_vm11, %v2037_v57  ;;  %v1411_v55 = vsel %vm1408_vm3, %v1378_v30, %v2222_v8  ;;  %v2412_v61 = vunpack.i.l.bf16 %v3747_v59  ;;  %v1428_v42 = vsel %vm1408_vm3, %v1395_v3, %v2263_v9  ;;  %v1427_v37 = vsel %vm1408_vm3, %v1394_v12, %v2262_v32 }
  0xfe   : > { %2090 = vmatpush3.bf16.xpose.msk.msra.mxu1 %vm3761_vm11, %v2037_v57  ;;  %v2416_v21 = vpop.permute.xlu0 %2415  ;;  %2710 = vrot.lane.b32.xlu1 %v3695_v35, %s2823_s30  ;;  %v1444_v45 = vsel %vm1441_vm4, %v1411_v55, %v2302_v18  ;;  %v1445_v26 = vsel %vm1441_vm4, %v1412_v10, %v2303_v43  ;;  %v2408_v8 = vunpack.i.h.bf16 %v3765_v5  ;;  %v2407_v2 = vunpack.i.l.bf16 %v3765_v5 }
  0xff   : > { %v2423_v46 = vunpack.i.h.bf16 %v3781_v0  ;;  %v2422_v59 = vunpack.i.l.bf16 %v3781_v0  ;;  %v1460_v9 = vsel %vm1441_vm4, %v1427_v37, %v2342_v15  ;;  %v1461_v32 = vsel %vm1441_vm4, %v1428_v42, %v2343_v52 }
 0x100   : > { %2705 = vrot.lane.b32.xlu0 %v4294_v13, %s2822_s29  ;;  %v2431_v57 = vpop.permute.xlu1 %2430  ;;  %v2418_v54 = vunpack.i.h.bf16 %v2416_v21  ;;  %v2417_v18 = vunpack.i.l.bf16 %v2416_v21  ;;  %v1478_v30 = vsel %vm1474_vm5, %v1445_v26, %v2413_v40  ;;  %v1494_v21 = vsel %vm1474_vm5, %v1461_v32, %v2408_v8 }
 0x101   : > { %v2433_v3 = vunpack.i.h.bf16 %v2431_v57  ;;  %v2432_v5 = vunpack.i.l.bf16 %v2431_v57  ;;  %v1493_v52 = vsel %vm1474_vm5, %v1460_v9, %v2407_v2  ;;  %v4295_v14 = vpack.i.bf16 %v3755_v6, %v3752_v7  ;;  %v3921_v7 = vld [vmem:[%s4212_s2] sm:$0xff]  ;;  %v3926_v6 = vld [vmem:[%s4212_s2 + $0x8] sm:$0xff] }
 0x102   : > { %v2426_v1 = vpop.permute.xlu0 %2425  ;;  %2720 = vrot.lane.b32.xlu1 %v3663_v28, %s2818_s25  ;;  %v1477_v28 = vsel %vm1474_vm5, %v1444_v45, %v2412_v61  ;;  %v1511_v61 = vsel %vm1507_vm6, %v1478_v30, %v2423_v46  ;;  %v1526_v40 = vsel %vm1507_vm6, %v1493_v52, %v2417_v18  ;;  %v1527_v57 = vsel %vm1507_vm6, %v1494_v21, %v2418_v54 }
 0x103   : > { %v2428_v12 = vunpack.i.h.bf16 %v2426_v1  ;;  %v2427_v55 = vunpack.i.l.bf16 %v2426_v1  ;;  %v1510_v15 = vsel %vm1507_vm6, %v1477_v28, %v2422_v59  ;;  %v1544_v26 = vsel %vm1540_vm7, %v1511_v61, %v2433_v3  ;;  %2030 = vmatprep.mubr.msk.f32.mxu0 %vm1653_vm10, %v3921_v7  ;;  %2032 = vmatprep.mubr.msk.f32.mxu1 %vm1653_vm10, %v3926_v6 }
 0x104   : > { %2715 = vrot.lane.b32.xlu0 %v3260_v33, %s2823_s30  ;;  %v2441_v43 = vpop.permute.xlu1 %2440  ;;  %v605_v3 = vrot.slane %v3794_v63, 2  ;;  %v2147_v21 = vunpack.i.l.bf16 %v3375_v29  ;;  %v604_v63 = vsel %vm500_vm1, %v602_v31, %v603_v11  ;;  %v2187_v52 = vunpack.i.l.bf16 %v3409_v23 }
 0x105   : > { %v2443_v10 = vunpack.i.h.bf16 %v2441_v43  ;;  %v2442_v0 = vunpack.i.l.bf16 %v2441_v43  ;;  %v1559_v2 = vsel %vm1540_vm7, %v1526_v40, %v2427_v55  ;;  %v1560_v46 = vsel %vm1540_vm7, %v1527_v57, %v2428_v12  ;;  %v2784_v40 = vld [vmem:[%s2876_s22 + $0x38] sm:$0xff] }
 0x106   : > { %v2436_v62 = vpop.permute.xlu0 %2435  ;;  %2730 = vrot.lane.b32.xlu1 %v4294_v13, %s2819_s26  ;;  %v1543_v13 = vsel %vm1540_vm7, %v1510_v15, %v2432_v5  ;;  %v2228_v15 = vunpack.i.h.bf16 %v3439_v51  ;;  %v606_v47 = vsel %vm500_vm1, %v603_v11, %v605_v3  ;;  %v2308_v11 = vunpack.i.h.bf16 %v3578_v4 }
 0x107   : > { %v2438_v42 = vunpack.i.h.bf16 %v2436_v62  ;;  %v2437_v37 = vunpack.i.l.bf16 %v2436_v62  ;;  %v1576_v59 = vsel %vm1573_vm8, %v1543_v13, %v2442_v0  ;;  %v1577_v9 = vsel %vm1573_vm8, %v1544_v26, %v2443_v10  ;;  %v2787_v13 = vld [vmem:[%s2876_s22 + $0xf0] sm:$0xff] }
 0x108   : > { %2725 = vrot.lane.b32.xlu0 %v3675_v48, %s2819_s26  ;;  %v2451_v45 = vpop.permute.xlu1 %2450  ;;  %v2307_v31 = vunpack.i.l.bf16 %v3578_v4  ;;  %v2786_v4 = vld [vmem:[%s2876_s22 + $0xf8] sm:$0xff]  ;;  %v1396_v26 = vsel %vm1375_vm2, %v2787_v13, %v2187_v52 }
 0x109   : > { %v2453_v1 = vunpack.i.h.bf16 %v2451_v45  ;;  %v2452_v8 = vunpack.i.l.bf16 %v2451_v45  ;;  %v1592_v43 = vsel %vm1573_vm8, %v1559_v2, %v2437_v37  ;;  %v1593_v28 = vsel %vm1573_vm8, %v1560_v46, %v2438_v42  ;;  %v2785_v42 = vld [vmem:[%s2876_s22 + $0x30] sm:$0xff] }
 0x10a   : > { %v2446_v32 = vpop.permute.xlu0 %2445  ;;  %2740 = vrot.lane.b32.xlu1 %v3260_v33, %s2820_s27  ;;  %v601_v33 = vsel %vm419_vm0, %v598_v17, %v600_v60  ;;  %v2188_v60 = vunpack.i.h.bf16 %v3409_v23  ;;  %v2227_v23 = vunpack.i.l.bf16 %v3439_v51  ;;  %v2268_v51 = vunpack.i.h.bf16 %v3508_v24 }
 0x10b   : > { %v1609_v48 = vsel %vm1606_vm9, %v1576_v59, %v2452_v8  ;;  %v1610_v62 = vsel %vm1606_vm9, %v1577_v9, %v2453_v1  ;;  %v2448_v54 = vunpack.i.h.bf16 %v2446_v32  ;;  %v2447_v18 = vunpack.i.l.bf16 %v2446_v32 }
 0x10c   : > { %2735 = vrot.lane.b32.xlu0 %v3695_v35, %s2820_s27  ;;  %v3874_v30 = vpop.permute.xlu1 %2460  ;;  %v2043_v5 = vpack.c.bf16 %v1610_v62, %v1609_v48  ;;  %v2148_v35 = vunpack.i.h.bf16 %v3375_v29  ;;  %v2754_v17 = vpack.i.bf16 %v601_v33, %v3819_v44  ;;  %v2347_v44 = vunpack.i.l.bf16 %v3647_v27 }
 0x10d   : > { %v1625_v12 = vsel %vm1606_vm9, %v1592_v43, %v2447_v18  ;;  %v1626_v55 = vsel %vm1606_vm9, %v1593_v28, %v2448_v54  ;;  %v2764_v37 = vpack.i.bf16 %v606_v47, %v604_v63  ;;  %v1397_v45 = vsel %vm1375_vm2, %v2786_v4, %v2188_v60 }
 0x10e   : > { %v2040_v10 = vpack.c.bf16 %v1626_v55, %v1625_v12  ;;  %v3884_v0 = vpop.permute.xlu0 %2455  ;;  %2750 = vrot.lane.b32.xlu1 %v2749_v58, %s2821_s28  ;;  %v2267_v58 = vunpack.i.l.bf16 %v3508_v24  ;;  %v1381_v57 = vsel %vm1375_vm2, %v2784_v40, %v2148_v35  ;;  %v1380_v24 = vsel %vm1375_vm2, %v2785_v42, %v2147_v21  ;;  %v1642_v55 = vld [vmem:[%s4213_s3 + $0x8] sm:$0xff] }
 0x10f   : > { %v2348_v1 = vunpack.i.h.bf16 %v3647_v27  ;;  %v1413_v2 = vsel %vm1408_vm3, %v1380_v24, %v2227_v23  ;;  %v2463_v59 = vunpack.i.h.bf16 %v3874_v30  ;;  %v2462_v9 = vunpack.i.l.bf16 %v3874_v30 }
 0x110   : > { %2745 = vrot.lane.b32.xlu0 %v4295_v14, %s2821_s28  ;;  %2042 = vmatprep.subr.msk.bf16.mxu0 %vm3761_vm11, %v2040_v10  ;;  %v3907_v29 = vpop.permute.xlu1 %2470  ;;  %v1429_v46 = vsel %vm1408_vm3, %v1396_v26, %v2267_v58  ;;  %v1430_v32 = vsel %vm1408_vm3, %v1397_v45, %v2268_v51  ;;  %v1446_v48 = vsel %vm1441_vm4, %v1413_v2, %v2307_v31  ;;  %v2458_v18 = vunpack.i.h.bf16 %v3884_v0 }
 0x111   : > { %2083 = vmatprep.subr.msk.bf16.mxu1 %vm3761_vm11, %v2040_v10  ;;  %2045 = vmatpush3.bf16.xpose.msk.msra.mxu0 %vm3761_vm11, %v2043_v5  ;;  %v1462_v54 = vsel %vm1441_vm4, %v1429_v46, %v2347_v44  ;;  %v2457_v43 = vunpack.i.l.bf16 %v3884_v0  ;;  %v2473_v28 = vunpack.i.h.bf16 %v3907_v29  ;;  %v2472_v30 = vunpack.i.l.bf16 %v3907_v29 }
 0x112   : > { %2091 = vmatpush3.bf16.xpose.msk.msra.mxu1 %vm3761_vm11, %v2043_v5  ;;  %v2466_v61 = vpop.permute.xlu0 %2465  ;;  %2760 = vrot.lane.b32.xlu1 %v4269_v56, %s2822_s29  ;;  %v1414_v56 = vsel %vm1408_vm3, %v1381_v57, %v2228_v15  ;;  %v1463_v33 = vsel %vm1441_vm4, %v1430_v32, %v2348_v1  ;;  %v2824_v21 = vmov 0  }
 0x113   : > { %v1447_v62 = vsel %vm1441_vm4, %v1414_v56, %v2308_v11  ;;  %v2468_v3 = vunpack.i.h.bf16 %v2466_v61  ;;  %v2467_v5 = vunpack.i.l.bf16 %v2466_v61  ;;  %2775 = vset.pattern.permute.xlu1 %v2824_v21  ;;  %2774 = vset.pattern.permute.xlu0 %v2824_v21  ;;  %v1495_v29 = vsel %vm1474_vm5, %v1462_v54, %v2457_v43  ;;  %v2790_v21 = vld [vmem:[%s2876_s22 + $0x110] sm:$0xff] }
 0x114   : > { %2755 = vrot.lane.b32.xlu0 %v2754_v17, %s2822_s29  ;;  %v2481_v8 = vpop.permute.xlu1 %2480  ;;  %v1480_v10 = vsel %vm1474_vm5, %v1447_v62, %v2463_v59  ;;  %v1641_v17 = vld [vmem:[%s4213_s3] sm:$0xff]  ;;  %v1496_v47 = vsel %vm1474_vm5, %v1463_v33, %v2458_v18  ;;  %v2153_v18 = vunpack.i.h.bf16 %v3381_v41  ;;  %v2152_v43 = vunpack.i.l.bf16 %v3381_v41 }
 0x115   : > { %v2483_v0 = vunpack.i.h.bf16 %v2481_v8  ;;  %v2482_v35 = vunpack.i.l.bf16 %v2481_v8  ;;  %v1513_v58 = vsel %vm1507_vm6, %v1480_v10, %v2473_v28  ;;  %v1528_v51 = vsel %vm1507_vm6, %v1495_v29, %v2467_v5  ;;  %v2788_v10 = vld [vmem:[%s2876_s22 + $0x50] sm:$0xff] }
 0x116   : > { %v2476_v27 = vpop.permute.xlu0 %2475  ;;  %2770 = vrot.lane.b32.xlu1 %v3258_v22, %s2823_s30  ;;  %v1479_v22 = vsel %vm1474_vm5, %v1446_v48, %v2462_v9  ;;  %v1529_v11 = vsel %vm1507_vm6, %v1496_v47, %v2468_v3  ;;  %v2193_v28 = vunpack.i.h.bf16 %v3407_v20  ;;  %v2233_v3 = vunpack.i.h.bf16 %v3437_v38 }
 0x117   : > { %v2478_v63 = vunpack.i.h.bf16 %v2476_v27  ;;  %v2477_v60 = vunpack.i.l.bf16 %v2476_v27  ;;  %v1512_v23 = vsel %vm1507_vm6, %v1479_v22, %v2472_v30  ;;  %v1546_v57 = vsel %vm1540_vm7, %v1513_v58, %v2483_v0 }
 0x118   : > { %2765 = vrot.lane.b32.xlu0 %v2764_v37, %s2823_s30  ;;  %v2491_v12 = vpop.permute.xlu1 %2490  ;;  %v1545_v40 = vsel %vm1540_vm7, %v1512_v23, %v2482_v35  ;;  %v2192_v30 = vunpack.i.l.bf16 %v3407_v20  ;;  %v2232_v5 = vunpack.i.l.bf16 %v3437_v38  ;;  %v2273_v41 = vunpack.i.h.bf16 %v3504_v49  ;;  %v2789_v35 = vld [vmem:[%s2876_s22 + $0x48] sm:$0xff] }
 0x119   : > { %v2493_v52 = vunpack.i.h.bf16 %v2491_v12  ;;  %v2492_v15 = vunpack.i.l.bf16 %v2491_v12  ;;  %v1561_v37 = vsel %vm1540_vm7, %v1528_v51, %v2477_v60  ;;  %v1562_v4 = vsel %vm1540_vm7, %v1529_v11, %v2478_v63  ;;  %v2791_v63 = vld [vmem:[%s2876_s22 + $0x108] sm:$0xff] }
 0x11a   : > { %v2486_v14 = vpop.permute.xlu0 %2485  ;;  %1650 = vperm.xlu1 %2775, %v1642_v55   ;;  %v2272_v20 = vunpack.i.l.bf16 %v3504_v49  ;;  %v2313_v12 = vunpack.i.h.bf16 %v3576_v19  ;;  %v2312_v55 = vunpack.i.l.bf16 %v3576_v19  ;;  %v1383_v0 = vsel %vm1375_vm2, %v2788_v10, %v2153_v18 }
 0x11b   : > { %v2488_v31 = vunpack.i.h.bf16 %v2486_v14  ;;  %v2487_v44 = vunpack.i.l.bf16 %v2486_v14  ;;  %v1578_v45 = vsel %vm1573_vm8, %v1545_v40, %v2492_v15  ;;  %v1579_v13 = vsel %vm1573_vm8, %v1546_v57, %v2493_v52 }
 0x11c   : > { %v2501_v61 = vpop.permute.xlu1 %2500  ;;  %1645 = vperm.xlu0 %2774, %v1641_v17   ;;  %v1382_v38 = vsel %vm1375_vm2, %v2789_v35, %v2152_v43  ;;  %v1399_v17 = vsel %vm1375_vm2, %v2790_v21, %v2193_v28  ;;  %v1398_v60 = vsel %vm1375_vm2, %v2791_v63, %v2192_v30  ;;  %v2353_v52 = vunpack.i.h.bf16 %v3641_v53 }
 0x11d   : > { %v2503_v42 = vunpack.i.h.bf16 %v2501_v61  ;;  %v2502_v24 = vunpack.i.l.bf16 %v2501_v61  ;;  %v1594_v46 = vsel %vm1573_vm8, %v1561_v37, %v2487_v44  ;;  %v1595_v59 = vsel %vm1573_vm8, %v1562_v4, %v2488_v31 }
 0x11e   : > { %v2496_v26 = vpop.permute.xlu0 %2495  ;;  %v2352_v49 = vunpack.i.l.bf16 %v3641_v53  ;;  %v1416_v19 = vsel %vm1408_vm3, %v1383_v0, %v2233_v3  ;;  %v1415_v14 = vsel %vm1408_vm3, %v1382_v38, %v2232_v5  ;;  %v1432_v23 = vsel %vm1408_vm3, %v1399_v17, %v2273_v41 }
 0x11f   : > { %v1611_v56 = vsel %vm1606_vm9, %v1578_v45, %v2502_v24  ;;  %v1612_v1 = vsel %vm1606_vm9, %v1579_v13, %v2503_v42  ;;  %v2498_v8 = vunpack.i.h.bf16 %v2496_v26  ;;  %v2497_v2 = vunpack.i.l.bf16 %v2496_v26 }
 0x120   : > { %v2511_v9 = vpop.permute.xlu1 %2510  ;;  %v2049_v32 = vpack.c.bf16 %v1612_v1, %v1611_v56  ;;  %v1431_v58 = vsel %vm1408_vm3, %v1398_v60, %v2272_v20  ;;  %v1448_v51 = vsel %vm1441_vm4, %v1415_v14, %v2312_v55  ;;  %v1449_v11 = vsel %vm1441_vm4, %v1416_v19, %v2313_v12 }
 0x121   : > { %v1627_v48 = vsel %vm1606_vm9, %v1594_v46, %v2497_v2  ;;  %v1628_v62 = vsel %vm1606_vm9, %v1595_v59, %v2498_v8  ;;  %v2513_v29 = vunpack.i.h.bf16 %v2511_v9  ;;  %v2512_v47 = vunpack.i.l.bf16 %v2511_v9 }
 0x122   : > { %v2046_v54 = vpack.c.bf16 %v1628_v62, %v1627_v48  ;;  %v2506_v27 = vpop.permute.xlu0 %2505  ;;  %v1464_v57 = vsel %vm1441_vm4, %v1431_v58, %v2352_v49  ;;  %v1465_v42 = vsel %vm1441_vm4, %v1432_v23, %v2353_v52 }
 0x123   : > { %v2508_v44 = vunpack.i.h.bf16 %v2506_v27  ;;  %v2507_v61 = vunpack.i.l.bf16 %v2506_v27  ;;  %v1482_v45 = vsel %vm1474_vm5, %v1449_v11, %v2513_v29  ;;  %v1481_v13 = vsel %vm1474_vm5, %v1448_v51, %v2512_v47 }
 0x124   : > { %2048 = vmatprep.subr.msk.bf16.mxu0 %vm3761_vm11, %v2046_v54  ;;  %2084 = vmatprep.subr.msk.bf16.mxu1 %vm3761_vm11, %v2046_v54  ;;  %v2521_v33 = vpop.permute.xlu1 %2520 }
 0x125   : > { %2051 = vmatpush3.bf16.xpose.msk.msra.mxu0 %vm3761_vm11, %v2049_v32  ;;  %2092 = vmatpush3.bf16.xpose.msk.msra.mxu1 %vm3761_vm11, %v2049_v32  ;;  %v2523_v40 = vunpack.i.h.bf16 %v2521_v33  ;;  %v2522_v53 = vunpack.i.l.bf16 %v2521_v33  ;;  %v1498_v9 = vsel %vm1474_vm5, %v1465_v42, %v2508_v44  ;;  %v1497_v32 = vsel %vm1474_vm5, %v1464_v57, %v2507_v61 }
 0x126   : > { %v2516_v22 = vpop.permute.xlu0 %2515 }
 0x127   : > { %v2518_v24 = vunpack.i.h.bf16 %v2516_v22  ;;  %v2517_v37 = vunpack.i.l.bf16 %v2516_v22  ;;  %v1514_v48 = vsel %vm1507_vm6, %v1481_v13, %v2522_v53  ;;  %v1515_v62 = vsel %vm1507_vm6, %v1482_v45, %v2523_v40 }
 0x128   : > { %v2531_v15 = vpop.permute.xlu1 %2530 }
 0x129   : > { %v2533_v26 = vunpack.i.h.bf16 %v2531_v15  ;;  %v2532_v56 = vunpack.i.l.bf16 %v2531_v15  ;;  %v1530_v54 = vsel %vm1507_vm6, %v1497_v32, %v2517_v37  ;;  %v1531_v27 = vsel %vm1507_vm6, %v1498_v9, %v2518_v24 }
 0x12a   : > { %v2526_v31 = vpop.permute.xlu0 %2525 }
 0x12b   : > { %v2528_v1 = vunpack.i.h.bf16 %v2526_v31  ;;  %v2527_v8 = vunpack.i.l.bf16 %v2526_v31  ;;  %v1547_v30 = vsel %vm1540_vm7, %v1514_v48, %v2532_v56  ;;  %v1548_v33 = vsel %vm1540_vm7, %v1515_v62, %v2533_v26 }
 0x12c   : > { %v2541_v4 = vpop.permute.xlu1 %2540 }
 0x12d   : > { %v2543_v2 = vunpack.i.h.bf16 %v2541_v4  ;;  %v2542_v46 = vunpack.i.l.bf16 %v2541_v4  ;;  %v1563_v41 = vsel %vm1540_vm7, %v1530_v54, %v2527_v8  ;;  %v1564_v20 = vsel %vm1540_vm7, %v1531_v27, %v2528_v1 }
 0x12e   : > { %v2536_v59 = vpop.permute.xlu0 %2535 }
 0x12f   : > { %v2538_v18 = vunpack.i.h.bf16 %v2536_v59  ;;  %v2537_v43 = vunpack.i.l.bf16 %v2536_v59  ;;  %v1580_v12 = vsel %vm1573_vm8, %v1547_v30, %v2542_v46  ;;  %v1581_v55 = vsel %vm1573_vm8, %v1548_v33, %v2543_v2 }
 0x130   : > { %v2551_v28 = vpop.permute.xlu1 %2550 }
 0x131   : > { %v2553_v3 = vunpack.i.h.bf16 %v2551_v28  ;;  %v2552_v5 = vunpack.i.l.bf16 %v2551_v28  ;;  %v1596_v21 = vsel %vm1573_vm8, %v1563_v41, %v2537_v43  ;;  %v1597_v17 = vsel %vm1573_vm8, %v1564_v20, %v2538_v18 }
 0x132   : > { %v2546_v22 = vpop.permute.xlu0 %2545 }
 0x133   : > { %v1613_v10 = vsel %vm1606_vm9, %v1580_v12, %v2552_v5  ;;  %v1614_v0 = vsel %vm1606_vm9, %v1581_v55, %v2553_v3  ;;  %v2548_v35 = vunpack.i.h.bf16 %v2546_v22  ;;  %v2547_v38 = vunpack.i.l.bf16 %v2546_v22 }
 0x134   : > { %v2561_v63 = vpop.permute.xlu1 %2560  ;;  %v2055_v60 = vpack.c.bf16 %v1614_v0, %v1613_v10 }
 0x135   : > { %v1629_v52 = vsel %vm1606_vm9, %v1596_v21, %v2547_v38  ;;  %v1630_v49 = vsel %vm1606_vm9, %v1597_v17, %v2548_v35  ;;  %v2563_v11 = vunpack.i.h.bf16 %v2561_v63  ;;  %v2562_v31 = vunpack.i.l.bf16 %v2561_v63 }
 0x136   : > { %v2052_v15 = vpack.c.bf16 %v1630_v49, %v1629_v52  ;;  %v2556_v19 = vpop.permute.xlu0 %2555 }
 0x137   : > { %v2558_v47 = vunpack.i.h.bf16 %v2556_v19  ;;  %v2557_v23 = vunpack.i.l.bf16 %v2556_v19 }
 0x138   : > { %2054 = vmatprep.subr.msk.bf16.mxu0 %vm3761_vm11, %v2052_v15  ;;  %2085 = vmatprep.subr.msk.bf16.mxu1 %vm3761_vm11, %v2052_v15  ;;  %v2571_v14 = vpop.permute.xlu1 %2570 }
 0x139   : > { %2057 = vmatpush3.bf16.xpose.msk.msra.mxu0 %vm3761_vm11, %v2055_v60  ;;  %2093 = vmatpush3.bf16.xpose.msk.msra.mxu1 %vm3761_vm11, %v2055_v60  ;;  %v1466_v44 = vsel %vm1441_vm4, %v3540_v50, %v2557_v23  ;;  %v1467_v61 = vsel %vm1441_vm4, %v3543_v25, %v2558_v47  ;;  %v2573_v40 = vunpack.i.h.bf16 %v2571_v14  ;;  %v2572_v53 = vunpack.i.l.bf16 %v2571_v14 }
 0x13a   : > { %v2566_v29 = vpop.permute.xlu0 %2565  ;;  %v1499_v13 = vsel %vm1474_vm5, %v1466_v44, %v2562_v31  ;;  %v1500_v26 = vsel %vm1474_vm5, %v1467_v61, %v2563_v11 }
 0x13b   : > { %v1532_v56 = vsel %vm1507_vm6, %v1499_v13, %v2572_v53  ;;  %v1533_v1 = vsel %vm1507_vm6, %v1500_v26, %v2573_v40  ;;  %v2568_v50 = vunpack.i.h.bf16 %v2566_v29  ;;  %v2567_v8 = vunpack.i.l.bf16 %v2566_v29  ;;  %v4296_v53 = vld [vmem:[#allocation9_spill] sm:$0xff]  ;;  %v4298_v13 = vld [vmem:[#allocation12_spill] sm:$0xff] }
 0x13c   : > { %v2581_v58 = vpop.permute.xlu1 %2580 }
 0x13d   : > { %v2583_v42 = vunpack.i.h.bf16 %v2581_v58  ;;  %v2582_v24 = vunpack.i.l.bf16 %v2581_v58  ;;  %v1483_v20 = vsel %vm1474_vm5, %v3597_v16, %v2567_v8  ;;  %v1484_v12 = vsel %vm1474_vm5, %v3601_v36, %v2568_v50 }
 0x13e   : > { %v2576_v51 = vpop.permute.xlu0 %2575 }
 0x13f   : > { %v1565_v25 = vsel %vm1540_vm7, %v1532_v56, %v2582_v24  ;;  %v1566_v46 = vsel %vm1540_vm7, %v1533_v1, %v2583_v42  ;;  %v2578_v32 = vunpack.i.h.bf16 %v2576_v51  ;;  %v2577_v48 = vunpack.i.l.bf16 %v2576_v51 }
 0x140   : > { %v2591_v57 = vpop.permute.xlu1 %2590 }
 0x141   : > { %v2593_v37 = vunpack.i.h.bf16 %v2591_v57  ;;  %v2592_v4 = vunpack.i.l.bf16 %v2591_v57  ;;  %v1516_v55 = vsel %vm1507_vm6, %v1483_v20, %v2577_v48  ;;  %v1517_v22 = vsel %vm1507_vm6, %v1484_v12, %v2578_v32 }
 0x142   : > { %v2586_v45 = vpop.permute.xlu0 %2585 }
 0x143   : > { %v1598_v62 = vsel %vm1573_vm8, %v1565_v25, %v2592_v4  ;;  %v1599_v54 = vsel %vm1573_vm8, %v1566_v46, %v2593_v37  ;;  %v2588_v18 = vunpack.i.h.bf16 %v2586_v45  ;;  %v2587_v43 = vunpack.i.l.bf16 %v2586_v45  ;;  %v4297_v4 = vld [vmem:[#allocation2_spill] sm:$0xff] }
 0x144   : > { %v2601_v2 = vpop.permute.xlu1 %2600 }
 0x145   : > { %v2603_v59 = vunpack.i.h.bf16 %v2601_v2  ;;  %v2602_v9 = vunpack.i.l.bf16 %v2601_v2  ;;  %v1549_v0 = vsel %vm1540_vm7, %v1516_v55, %v2587_v43  ;;  %v1550_v35 = vsel %vm1540_vm7, %v1517_v22, %v2588_v18 }
 0x146   : > { %v2596_v27 = vpop.permute.xlu0 %2595 }
 0x147   : > { %v1631_v28 = vsel %vm1606_vm9, %v1598_v62, %v2602_v9  ;;  %v1632_v30 = vsel %vm1606_vm9, %v1599_v54, %v2603_v59  ;;  %v2598_v3 = vunpack.i.h.bf16 %v2596_v27  ;;  %v2597_v5 = vunpack.i.l.bf16 %v2596_v27 }
 0x148   : > { %v2058_v33 = vpack.c.bf16 %v1632_v30, %v1631_v28  ;;  %v2611_v41 = vpop.permute.xlu1 %2610 }
 0x149   : > { %v1582_v21 = vsel %vm1573_vm8, %v1549_v0, %v2597_v5  ;;  %v1583_v36 = vsel %vm1573_vm8, %v1550_v35, %v2598_v3  ;;  %v2613_v14 = vunpack.i.h.bf16 %v2611_v41  ;;  %v2612_v29 = vunpack.i.l.bf16 %v2611_v41 }
 0x14a   : > { %v2606_v10 = vpop.permute.xlu0 %2605  ;;  %2060 = vmatprep.subr.msk.bf16.mxu0 %vm3761_vm11, %v2058_v33  ;;  %2086 = vmatprep.subr.msk.bf16.mxu1 %vm3761_vm11, %v2058_v33 }
 0x14b   : > { %v2608_v38 = vunpack.i.h.bf16 %v2606_v10  ;;  %v2607_v16 = vunpack.i.l.bf16 %v2606_v10  ;;  %v1469_v40 = vsel %vm1441_vm4, %v3526_v39, %v2613_v14  ;;  %v1468_v57 = vsel %vm1441_vm4, %v4296_v53, %v2612_v29 }
 0x14c   : > { %v2621_v17 = vpop.permute.xlu1 %2620 }
 0x14d   : > { %v1615_v63 = vsel %vm1606_vm9, %v1582_v21, %v2607_v16  ;;  %v1616_v60 = vsel %vm1606_vm9, %v1583_v36, %v2608_v38  ;;  %v2623_v23 = vunpack.i.h.bf16 %v2621_v17  ;;  %v2622_v58 = vunpack.i.l.bf16 %v2621_v17 }
 0x14e   : > { %v2061_v52 = vpack.c.bf16 %v1616_v60, %v1615_v63  ;;  %v2616_v49 = vpop.permute.xlu0 %2615 }
 0x14f   : > { %v2618_v11 = vunpack.i.h.bf16 %v2616_v49  ;;  %v2617_v31 = vunpack.i.l.bf16 %v2616_v49  ;;  %v1486_v45 = vsel %vm1474_vm5, %v4297_v4, %v2623_v23  ;;  %v1485_v26 = vsel %vm1474_vm5, %v4298_v13, %v2622_v58  ;;  %v4299_v58 = vld [vmem:[#allocation14_spill] sm:$0xff] }
 0x150   : > { %2063 = vmatpush3.bf16.xpose.msk.msra.mxu0 %vm3761_vm11, %v2061_v52  ;;  %2094 = vmatpush3.bf16.xpose.msk.msra.mxu1 %vm3761_vm11, %v2061_v52  ;;  %v2631_v15 = vpop.permute.xlu1 %2630 }
 0x151   : > { %v2633_v44 = vunpack.i.h.bf16 %v2631_v15  ;;  %v2632_v61 = vunpack.i.l.bf16 %v2631_v15  ;;  %v1502_v39 = vsel %vm1474_vm5, %v1469_v40, %v2618_v11  ;;  %v1501_v59 = vsel %vm1474_vm5, %v1468_v57, %v2617_v31  ;;  %v4300_v11 = vld [vmem:[#allocation4_spill] sm:$0xff] }
 0x152   : > { %v2626_v19 = vpop.permute.xlu0 %2625 }
 0x153   : > { %v2628_v42 = vunpack.i.h.bf16 %v2626_v19  ;;  %v2627_v24 = vunpack.i.l.bf16 %v2626_v19  ;;  %v1518_v9 = vsel %vm1507_vm6, %v1485_v26, %v2632_v61  ;;  %v1519_v32 = vsel %vm1507_vm6, %v1486_v45, %v2633_v44 }
 0x154   : > { %v2641_v47 = vpop.permute.xlu1 %2640 }
 0x155   : > { %v2643_v56 = vunpack.i.h.bf16 %v2641_v47  ;;  %v2642_v1 = vunpack.i.l.bf16 %v2641_v47  ;;  %v1534_v48 = vsel %vm1507_vm6, %v1501_v59, %v2627_v24  ;;  %v1535_v62 = vsel %vm1507_vm6, %v1502_v39, %v2628_v42 }
 0x156   : > { %v2636_v51 = vpop.permute.xlu0 %2635 }
 0x157   : > { %v2638_v50 = vunpack.i.h.bf16 %v2636_v51  ;;  %v2637_v8 = vunpack.i.l.bf16 %v2636_v51  ;;  %v1551_v43 = vsel %vm1540_vm7, %v1518_v9, %v2642_v1  ;;  %v1552_v28 = vsel %vm1540_vm7, %v1519_v32, %v2643_v56 }
 0x158   : > { %v2651_v37 = vpop.permute.xlu1 %2650 }
 0x159   : > { %v2653_v2 = vunpack.i.h.bf16 %v2651_v37  ;;  %v2652_v25 = vunpack.i.l.bf16 %v2651_v37  ;;  %v1567_v3 = vsel %vm1540_vm7, %v1534_v48, %v2637_v8  ;;  %v1568_v5 = vsel %vm1540_vm7, %v1535_v62, %v2638_v50 }
 0x15a   : > { %v2646_v46 = vpop.permute.xlu0 %2645 }
 0x15b   : > { %v2648_v54 = vunpack.i.h.bf16 %v2646_v46  ;;  %v2647_v27 = vunpack.i.l.bf16 %v2646_v46  ;;  %v1584_v41 = vsel %vm1573_vm8, %v1551_v43, %v2652_v25  ;;  %v1585_v20 = vsel %vm1573_vm8, %v1552_v28, %v2653_v2 }
 0x15c   : > { %v2661_v18 = vpop.permute.xlu1 %2660 }
 0x15d   : > { %v2663_v30 = vunpack.i.h.bf16 %v2661_v18  ;;  %v2662_v33 = vunpack.i.l.bf16 %v2661_v18  ;;  %v1600_v35 = vsel %vm1573_vm8, %v1567_v3, %v2647_v27  ;;  %v1601_v38 = vsel %vm1573_vm8, %v1568_v5, %v2648_v54  ;;  %v4301_v3 = vld [vmem:[#allocation6_spill] sm:$0xff] }
 0x15e   : > { %v2656_v12 = vpop.permute.xlu0 %2655 }
 0x15f   : > { %v1617_v55 = vsel %vm1606_vm9, %v1584_v41, %v2662_v33  ;;  %v1618_v22 = vsel %vm1606_vm9, %v1585_v20, %v2663_v30  ;;  %v2658_v10 = vunpack.i.h.bf16 %v2656_v12  ;;  %v2657_v0 = vunpack.i.l.bf16 %v2656_v12  ;;  %v4302_v41 = vld [vmem:[#allocation5_spill] sm:$0xff] }
 0x160   : > { %v2067_v16 = vpack.c.bf16 %v1618_v22, %v1617_v55  ;;  %v2671_v21 = vpop.permute.xlu1 %2670 }
 0x161   : > { %v1633_v36 = vsel %vm1606_vm9, %v1600_v35, %v2657_v0  ;;  %v1634_v17 = vsel %vm1606_vm9, %v1601_v38, %v2658_v10  ;;  %v2673_v47 = vunpack.i.h.bf16 %v2671_v21  ;;  %v2672_v23 = vunpack.i.l.bf16 %v2671_v21 }
 0x162   : > { %v2064_v63 = vpack.c.bf16 %v1634_v17, %v1633_v36  ;;  %v2666_v60 = vpop.permute.xlu0 %2665 }
 0x163   : > { %v2668_v15 = vunpack.i.h.bf16 %v2666_v60  ;;  %v2667_v19 = vunpack.i.l.bf16 %v2666_v60 }
 0x164   : > { %2066 = vmatprep.subr.msk.bf16.mxu0 %vm3761_vm11, %v2064_v63  ;;  %2087 = vmatprep.subr.msk.bf16.mxu1 %vm3761_vm11, %v2064_v63  ;;  %v2681_v52 = vpop.permute.xlu1 %2680 }
 0x165   : > { %2069 = vmatpush3.bf16.xpose.msk.msra.mxu0 %vm3761_vm11, %v2067_v16  ;;  %2095 = vmatpush3.bf16.xpose.msk.msra.mxu1 %vm3761_vm11, %v2067_v16  ;;  %v1470_v51 = vsel %vm1441_vm4, %v4299_v58, %v2667_v19  ;;  %v1471_v31 = vsel %vm1441_vm4, %v4300_v11, %v2668_v15  ;;  %v2683_v44 = vunpack.i.h.bf16 %v2681_v52  ;;  %v2682_v61 = vunpack.i.l.bf16 %v2681_v52 }
 0x166   : > { %v2676_v49 = vpop.permute.xlu0 %2675  ;;  %v1503_v4 = vsel %vm1474_vm5, %v1470_v51, %v2672_v23  ;;  %v1504_v45 = vsel %vm1474_vm5, %v1471_v31, %v2673_v47 }
 0x167   : > { %v1536_v13 = vsel %vm1507_vm6, %v1503_v4, %v2682_v61  ;;  %v1537_v26 = vsel %vm1507_vm6, %v1504_v45, %v2683_v44  ;;  %v2678_v56 = vunpack.i.h.bf16 %v2676_v49  ;;  %v2677_v1 = vunpack.i.l.bf16 %v2676_v49  ;;  %v4303_v61 = vld [vmem:[#allocation10_spill] sm:$0xff]  ;;  %v4305_v4 = vld [vmem:[#allocation15_spill] sm:$0xff] }
 0x168   : > { %v2691_v14 = vpop.permute.xlu1 %2690 }
 0x169   : > { %v2693_v53 = vunpack.i.h.bf16 %v2691_v14  ;;  %v2692_v57 = vunpack.i.l.bf16 %v2691_v14  ;;  %v1487_v5 = vsel %vm1474_vm5, %v4301_v3, %v2677_v1  ;;  %v1488_v20 = vsel %vm1474_vm5, %v4302_v41, %v2678_v56 }
 0x16a   : > { %v2686_v29 = vpop.permute.xlu0 %2685 }
 0x16b   : > { %v1569_v8 = vsel %vm1540_vm7, %v1536_v13, %v2692_v57  ;;  %v1570_v2 = vsel %vm1540_vm7, %v1537_v26, %v2693_v53  ;;  %v2688_v39 = vunpack.i.h.bf16 %v2686_v29  ;;  %v2687_v59 = vunpack.i.l.bf16 %v2686_v29  ;;  %v4304_v53 = vld [vmem:[#allocation11_spill] sm:$0xff] }
 0x16c   : > { %v2701_v40 = vpop.permute.xlu1 %2700  ;;  %v4306_v13 = vld [vmem:[#allocation3_spill] sm:$0xff] }
 0x16d   : > { %v2703_v42 = vunpack.i.h.bf16 %v2701_v40  ;;  %v2702_v24 = vunpack.i.l.bf16 %v2701_v40  ;;  %v1520_v12 = vsel %vm1507_vm6, %v1487_v5, %v2687_v59  ;;  %v1521_v55 = vsel %vm1507_vm6, %v1488_v20, %v2688_v39 }
 0x16e   : > { %v2696_v37 = vpop.permute.xlu0 %2695 }
 0x16f   : > { %v1602_v9 = vsel %vm1573_vm8, %v1569_v8, %v2702_v24  ;;  %v1603_v32 = vsel %vm1573_vm8, %v1570_v2, %v2703_v42  ;;  %v2698_v62 = vunpack.i.h.bf16 %v2696_v37  ;;  %v2697_v54 = vunpack.i.l.bf16 %v2696_v37 }
 0x170   : > { %v2711_v50 = vpop.permute.xlu1 %2710 }
 0x171   : > { %v2713_v25 = vunpack.i.h.bf16 %v2711_v50  ;;  %v2712_v46 = vunpack.i.l.bf16 %v2711_v50  ;;  %v1553_v10 = vsel %vm1540_vm7, %v1520_v12, %v2697_v54  ;;  %v1554_v0 = vsel %vm1540_vm7, %v1521_v55, %v2698_v62 }
 0x172   : > { %v2706_v48 = vpop.permute.xlu0 %2705 }
 0x173   : > { %v1635_v27 = vsel %vm1606_vm9, %v1602_v9, %v2712_v46  ;;  %v1636_v18 = vsel %vm1606_vm9, %v1603_v32, %v2713_v25  ;;  %v2708_v28 = vunpack.i.h.bf16 %v2706_v48  ;;  %v2707_v30 = vunpack.i.l.bf16 %v2706_v48 }
 0x174   : > { %v2070_v43 = vpack.c.bf16 %v1636_v18, %v1635_v27  ;;  %v2721_v33 = vpop.permute.xlu1 %2720 }
 0x175   : > { %v1586_v16 = vsel %vm1573_vm8, %v1553_v10, %v2707_v30  ;;  %v1587_v21 = vsel %vm1573_vm8, %v1554_v0, %v2708_v28  ;;  %v2723_v19 = vunpack.i.h.bf16 %v2721_v33  ;;  %v2722_v14 = vunpack.i.l.bf16 %v2721_v33 }
 0x176   : > { %v2716_v22 = vpop.permute.xlu0 %2715  ;;  %2072 = vmatprep.subr.msk.bf16.mxu0 %vm3761_vm11, %v2070_v43  ;;  %2088 = vmatprep.subr.msk.bf16.mxu1 %vm3761_vm11, %v2070_v43 }
 0x177   : > { %v2718_v35 = vunpack.i.h.bf16 %v2716_v22  ;;  %v2717_v38 = vunpack.i.l.bf16 %v2716_v22  ;;  %v1473_v40 = vsel %vm1441_vm4, %v4303_v61, %v2723_v19  ;;  %v1472_v57 = vsel %vm1441_vm4, %v4304_v53, %v2722_v14 }
 0x178   : > { %v2731_v36 = vpop.permute.xlu1 %2730 }
 0x179   : > { %v1619_v17 = vsel %vm1606_vm9, %v1586_v16, %v2717_v38  ;;  %v1620_v63 = vsel %vm1606_vm9, %v1587_v21, %v2718_v35  ;;  %v2733_v47 = vunpack.i.h.bf16 %v2731_v36  ;;  %v2732_v23 = vunpack.i.l.bf16 %v2731_v36 }
 0x17a   : > { %v2073_v60 = vpack.c.bf16 %v1620_v63, %v1619_v17  ;;  %v2726_v52 = vpop.permute.xlu0 %2725 }
 0x17b   : > { %v2728_v51 = vunpack.i.h.bf16 %v2726_v52  ;;  %v2727_v11 = vunpack.i.l.bf16 %v2726_v52  ;;  %v1490_v45 = vsel %vm1474_vm5, %v4305_v4, %v2733_v47  ;;  %v1489_v26 = vsel %vm1474_vm5, %v4306_v13, %v2732_v23 }
 0x17c   : > { %2075 = vmatpush3.bf16.xpose.msk.msra.mxu0 %vm3761_vm11, %v2073_v60  ;;  %2096 = vmatpush3.bf16.xpose.msk.msra.mxu1 %vm3761_vm11, %v2073_v60  ;;  %v2741_v49 = vpop.permute.xlu1 %2740 }
 0x17d   : > { %v2743_v31 = vunpack.i.h.bf16 %v2741_v49  ;;  %v2742_v44 = vunpack.i.l.bf16 %v2741_v49  ;;  %v1506_v39 = vsel %vm1474_vm5, %v1473_v40, %v2728_v51  ;;  %v1505_v59 = vsel %vm1474_vm5, %v1472_v57, %v2727_v11 }
 0x17e   : > { %v2736_v15 = vpop.permute.xlu0 %2735 }
 0x17f   : > { %v2738_v42 = vunpack.i.h.bf16 %v2736_v15  ;;  %v2737_v24 = vunpack.i.l.bf16 %v2736_v15  ;;  %v1522_v9 = vsel %vm1507_vm6, %v1489_v26, %v2742_v44  ;;  %v1523_v32 = vsel %vm1507_vm6, %v1490_v45, %v2743_v31 }
 0x180   : > { %v2751_v29 = vpop.permute.xlu1 %2750 }
 0x181   : > { %v2753_v56 = vunpack.i.h.bf16 %v2751_v29  ;;  %v2752_v1 = vunpack.i.l.bf16 %v2751_v29  ;;  %v1538_v48 = vsel %vm1507_vm6, %v1505_v59, %v2737_v24  ;;  %v1539_v62 = vsel %vm1507_vm6, %v1506_v39, %v2738_v42 }
 0x182   : > { %v2746_v58 = vpop.permute.xlu0 %2745 }
 0x183   : > { %v2748_v50 = vunpack.i.h.bf16 %v2746_v58  ;;  %v2747_v8 = vunpack.i.l.bf16 %v2746_v58  ;;  %v1555_v43 = vsel %vm1540_vm7, %v1522_v9, %v2752_v1  ;;  %v1556_v28 = vsel %vm1540_vm7, %v1523_v32, %v2753_v56 }
 0x184   : > { %v2761_v37 = vpop.permute.xlu1 %2760 }
 0x185   : > { %v2763_v2 = vunpack.i.h.bf16 %v2761_v37  ;;  %v2762_v25 = vunpack.i.l.bf16 %v2761_v37  ;;  %v1571_v3 = vsel %vm1540_vm7, %v1538_v48, %v2747_v8  ;;  %v1572_v5 = vsel %vm1540_vm7, %v1539_v62, %v2748_v50 }
 0x186   : > { %v2756_v46 = vpop.permute.xlu0 %2755 }
 0x187   : > { %v2758_v54 = vunpack.i.h.bf16 %v2756_v46  ;;  %v2757_v27 = vunpack.i.l.bf16 %v2756_v46  ;;  %v1588_v41 = vsel %vm1573_vm8, %v1555_v43, %v2762_v25  ;;  %v1589_v20 = vsel %vm1573_vm8, %v1556_v28, %v2763_v2 }
 0x188   : > { %v2771_v18 = vpop.permute.xlu1 %2770 }
 0x189   : > { %v2773_v30 = vunpack.i.h.bf16 %v2771_v18  ;;  %v2772_v33 = vunpack.i.l.bf16 %v2771_v18  ;;  %v1604_v35 = vsel %vm1573_vm8, %v1571_v3, %v2757_v27  ;;  %v1605_v38 = vsel %vm1573_vm8, %v1572_v5, %v2758_v54 }
 0x18a   : > { %v2766_v12 = vpop.permute.xlu0 %2765 }
 0x18b   : > { %v1621_v55 = vsel %vm1606_vm9, %v1588_v41, %v2772_v33  ;;  %v1622_v22 = vsel %vm1606_vm9, %v1589_v20, %v2773_v30  ;;  %v2768_v10 = vunpack.i.h.bf16 %v2766_v12  ;;  %v2767_v0 = vunpack.i.l.bf16 %v2766_v12 }
 0x18c   : > { %v2079_v16 = vpack.c.bf16 %v1622_v22, %v1621_v55 }
 0x18d   : > { %v1637_v21 = vsel %vm1606_vm9, %v1604_v35, %v2767_v0  ;;  %v1638_v36 = vsel %vm1606_vm9, %v1605_v38, %v2768_v10 }
 0x18e   : > { %v2076_v17 = vpack.c.bf16 %v1638_v36, %v1637_v21 }
 0x190   : > { %2078 = vmatprep.subr.msk.bf16.mxu0 %vm3761_vm11, %v2076_v17  ;;  %2089 = vmatprep.subr.msk.bf16.mxu1 %vm3761_vm11, %v2076_v17 }
 0x191   : > { %2081 = vmatpush3.bf16.xpose.msk.msra.mxu0 %vm3761_vm11, %v2079_v16  ;;  %2097 = vmatpush3.bf16.xpose.msk.msra.mxu1 %vm3761_vm11, %v2079_v16 }
 0x198   : > { %2031 = vmatmul.mubr.msk.f32.vlgmr.msra.gmra.mrb[0].mxu0 %vm1653_vm10, %v3921_v7  ;;  %2033 = vmatmul.mubr.msk.f32.vlgmr.msra.gmra.mrb[0].mxu1 %vm1653_vm10, %v3926_v6 }
 0x199   : > { %v1651_v63 = vpop.permute.xlu1 %1650 }
 0x19b   : > { %v1646_v60 = vpop.permute.xlu0 %1645 }
 0x26b   : > { %v1822_v52 = vpop.f32.mrb[0].mxu0  ;;  %v1828_v49 = vpop.f32.mrb[0].mxu1 }
 0x26c   : > { %v1823_v15 = vadd.f32 %v1822_v52, %v1646_v60  ;;  %v1829_v19 = vadd.f32 %v1828_v49, %v1651_v63  ;;  %v1824_v14 = vpop.f32.mrb[1].mxu0  ;;  %v1830_v34 = vpop.f32.mrb[1].mxu1 }
 0x26d   : > { %v1825_v29 = vadd.f32 %v1824_v14, %v1646_v60  ;;  %v1831_v47 = vadd.f32 %v1830_v34, %v1651_v63 }
 0x26e   : > { %1833 = vst [vmem:[%s316_s24] sm:$0xff] %v1823_v15  ;;  %1835 = vst [vmem:[%s316_s24 + $0x10] sm:$0xff] %v1829_v19 }
 0x26f   : > { %1834 = vst [vmem:[%s316_s24 + $0x8] sm:$0xff] %v1825_v29  ;;  %1836 = vst [vmem:[%s316_s24 + $0x18] sm:$0xff] %v1831_v47 }
 0x270 PF: > { %s14_s17 = sadd.s32 1, %s2814_s17   ;;  %s4307_s15 = smov %s2810_s16 }
 0x271   : > { %p11_p5 = scmp.ge.s32.totalorder %s14_s17, 4   ;;  %s4308_s16 = smov %s4310_s18 }
 0x273   :  { %13 = sbr.rel (!%p11_p5) target bundleno = 2 (0x2), region = 69 }

</bundles_post_ra>
